<compile_context>
chip_gen: v6e
topology: v6e:2x2x1
jax: 0.10.0
libtpu: 0.0.40
codegen_flags: <defaults>
</compile_context>

<pallas_src>
import functools

import jax
import jax.numpy as jnp
from jax import lax
from jax.experimental import pallas as pl
from jax.experimental.pallas import tpu as pltpu

COMPUTE_DTYPE = jnp.bfloat16     # MXU operand dtype (accumulation always f32)
LN_EPS = 1e-6
GELU_C0 = 0.7978845608028654     # sqrt(2/pi)


@functools.lru_cache(maxsize=None)
def _vmem_limit():
    """Scoped-VMEM budget: ~3/4 of this generation's physical VMEM (fallback 64 MiB)."""
    try:
        cap = getattr(pltpu.get_tpu_info(), "vmem_capacity_bytes", None)
        if cap:
            return int(min(cap * 3 // 4, 100 * 1024 * 1024))
    except Exception:
        pass
    return 64 * 1024 * 1024


def _dot_nt(a, b):
    """a @ b.T without materializing a transpose: contract last dims, f32 accum."""
    return lax.dot_general(
        a, b, (((a.ndim - 1,), (b.ndim - 1,)), ((), ())),
        preferred_element_type=jnp.float32)


def _layernorm(x):
    mu = jnp.mean(x, axis=-1, keepdims=True)
    var = jnp.mean(jnp.square(x - mu), axis=-1, keepdims=True)
    return (x - mu) * lax.rsqrt(var + LN_EPS)


def _gelu_tanh(h):
    return 0.5 * h * (1.0 + jnp.tanh(GELU_C0 * (h + 0.044715 * h * h * h)))


# ----------------------------------------------------------------------------
# One-time parameter prep: bf16 weights, head-major out-proj, chunked adaLN.
# ----------------------------------------------------------------------------
def prepare_params(p, num_heads):
    D = p["wproj"].shape[0]
    hd = D // num_heads
    return {
        "adaln_w": p["adaln_w"].reshape(6, D, D).astype(COMPUTE_DTYPE),
        "adaln_b": p["adaln_b"].reshape(6, 1, D).astype(jnp.float32),
        "wqkv":    p["wqkv"].astype(COMPUTE_DTYPE),
        "bqkv":    p["bqkv"].astype(jnp.float32),
        "wproj_r": jnp.transpose(p["wproj"].reshape(D, num_heads, hd),
                                 (1, 2, 0)).astype(COMPUTE_DTYPE),   # (H, hd, D)
        "bproj":   p["bproj"].astype(jnp.float32),
        "gate_w":  p["gate_w"].astype(jnp.float32),   # router stays f32 for stability
        "w1":      p["w1"].astype(COMPUTE_DTYPE),
        "b1":      p["b1"].astype(jnp.float32),
        "w2":      p["w2"].astype(COMPUTE_DTYPE),
        "b2":      p["b2"].astype(jnp.float32),
    }


# ----------------------------------------------------------------------------
# Kernel 1: adaLN modulation  SiLU(c) @ W^T + b, tiled over the 6 output chunks
# ----------------------------------------------------------------------------
def adaln_kernel(c_ref, w_ref, b_ref, out_ref):
    c = c_ref[...]                                           # (B, D) f32
    silu = c * jax.nn.sigmoid(c)
    out_ref[...] = _dot_nt(silu.astype(COMPUTE_DTYPE), w_ref[...]) + b_ref[...]


def adaln_modulation(c, w6, b6):
    # w6: (6, D, D) bf16,  b6: (6, 1, D) f32  ->  (6, B, D) f32
    B, D = c.shape
    return pl.pallas_call(
        adaln_kernel,
        out_shape=jax.ShapeDtypeStruct((6, B, D), jnp.float32),
        grid=(6,),
        in_specs=[
            pl.BlockSpec((B, D), lambda i: (0, 0)),
            pl.BlockSpec((None, D, D), lambda i: (i, 0, 0)),
            pl.BlockSpec((None, 1, D), lambda i: (i, 0, 0)),
        ],
        out_specs=pl.BlockSpec((None, B, D), lambda i: (i, 0, 0)),
        compiler_params=pltpu.CompilerParams(
            dimension_semantics=("parallel",),
            vmem_limit_bytes=_vmem_limit()),
    )(c, w6, b6)


# ----------------------------------------------------------------------------
# Kernel 2: fused attention branch + MoE router epilogue (grid over B)
#   out    = x + gate_msa * Attn(modulate(LN(x), shift_msa, scale_msa))
#   logits = gate_w @ modulate(LN(out), shift_mlp, scale_mlp)^T      (E, S)
# ----------------------------------------------------------------------------
def attn_router_kernel(x_ref, shm_ref, scm_ref, gms_ref, shp_ref, scp_ref,
                       gw_ref, wqkv_ref, bqkv_ref, wpr_ref, bpj_ref,
                       out_ref, outbf_ref, logits_ref):
    S, D = x_ref.shape
    H, hd, _ = wpr_ref.shape
    x = x_ref[...]                                           # (S, D) f32

    xm = _layernorm(x) * (1.0 + scm_ref[...]) + shm_ref[...]
    qkv = _dot_nt(xm.astype(COMPUTE_DTYPE), wqkv_ref[...]) + bqkv_ref[...]   # (S,3D)

    def heads(t):                      # (S, D) bf16 -> (H, S, hd)
        return jnp.transpose(t.reshape(S, H, hd), (1, 0, 2))

    # fold 1/sqrt(hd) into q (S*hd mults, not S*S); cast to bf16 before the split
    q = heads((qkv[:, 0 * D:1 * D] * (hd ** -0.5)).astype(COMPUTE_DTYPE))
    k = heads(qkv[:, 1 * D:2 * D].astype(COMPUTE_DTYPE))
    v = heads(qkv[:, 2 * D:3 * D].astype(COMPUTE_DTYPE))

    s = jnp.einsum("hqd,hkd->hqk", q, k, preferred_element_type=jnp.float32)
    s = s - jnp.max(s, axis=-1, keepdims=True)
    p = jnp.exp(s)
    p = p * pl.reciprocal(jnp.sum(p, axis=-1, keepdims=True), approx=True)

    attn = jnp.einsum("hqk,hkd->hqd", p.astype(COMPUTE_DTYPE), v,
                      preferred_element_type=jnp.float32)    # (H, S, hd)

    # out-projection per head against the matching hd-slice of W_proj (head-major
    # layout), summed over heads on the VPU -> no (H,S,hd)->(S,D) XLU transpose.
    ph = jnp.einsum("hsd,hdo->hso", attn.astype(COMPUTE_DTYPE), wpr_ref[...],
                    preferred_element_type=jnp.float32)      # (H, S, D)
    proj = jnp.sum(ph, axis=0) + bpj_ref[...]

    out = x + gms_ref[...] * proj
    out_ref[...] = out
    outbf_ref[...] = out.astype(COMPUTE_DTYPE)

    # Router epilogue on the still-resident tile (lane-dense in tokens).
    xm2 = _layernorm(out) * (1.0 + scp_ref[...]) + shp_ref[...]
    logits_ref[...] = _dot_nt(gw_ref[...], xm2)              # (E, S) f32


def fused_attention_router(x, shift_msa, scale_msa, gate_msa, shift_mlp, scale_mlp,
                           gate_w, wqkv, bqkv, wproj_r, bproj):
    B, S, D = x.shape
    E = gate_w.shape[0]
    H, hd, _ = wproj_r.shape
    flops = B * (2 * S * D * 3 * D + 4 * H * S * S * hd + 2 * S * D * D + 2 * E * D * S)
    bytes_accessed = int(4 * (2 * B * S * D + B * E * S + 5 * B * D)
                         + 2 * (wqkv.size + wproj_r.size + B * S * D)
                         + 4 * (bqkv.size + bproj.size + gate_w.size))
    v1d = lambda t: t.reshape(B, 1, D)
    # TODO(synk): production S (1-4K) needs the flash-style split (qkv-proj /
    # online-softmax KV tiles / out-proj+router); this fused per-batch kernel
    # holds the (H,S,S) f32 scores in VMEM.
    return pl.pallas_call(
        attn_router_kernel,
        out_shape=(jax.ShapeDtypeStruct((B, S, D), jnp.float32),
                   jax.ShapeDtypeStruct((B, S, D), COMPUTE_DTYPE),
                   jax.ShapeDtypeStruct((B, E, S), jnp.float32)),
        grid=(B,),
        in_specs=[
            pl.BlockSpec((None, S, D), lambda b: (b, 0, 0)),          # x
            pl.BlockSpec((None, 1, D), lambda b: (b, 0, 0)),          # shift_msa
            pl.BlockSpec((None, 1, D), lambda b: (b, 0, 0)),          # scale_msa
            pl.BlockSpec((None, 1, D), lambda b: (b, 0, 0)),          # gate_msa
            pl.BlockSpec((None, 1, D), lambda b: (b, 0, 0)),          # shift_mlp
            pl.BlockSpec((None, 1, D), lambda b: (b, 0, 0)),          # scale_mlp
            pl.BlockSpec((E, D), lambda b: (0, 0)),                   # gate_w (f32)
            pl.BlockSpec((3 * D, D), lambda b: (0, 0)),               # wqkv (bf16)
            pl.BlockSpec((1, 3 * D), lambda b: (0, 0)),               # bqkv
            pl.BlockSpec((H, hd, D), lambda b: (0, 0, 0)),            # wproj_r (bf16)
            pl.BlockSpec((1, D), lambda b: (0, 0)),                   # bproj
        ],
        out_specs=(pl.BlockSpec((None, S, D), lambda b: (b, 0, 0)),
                   pl.BlockSpec((None, S, D), lambda b: (b, 0, 0)),
                   pl.BlockSpec((None, E, S), lambda b: (b, 0, 0))),
        compiler_params=pltpu.CompilerParams(
            dimension_semantics=("parallel",),
            vmem_limit_bytes=_vmem_limit()),
        cost_estimate=pl.CostEstimate(
            flops=int(flops),
            transcendentals=int(B * H * S * S),
            bytes_accessed=bytes_accessed),
    )(x, v1d(shift_msa), v1d(scale_msa), v1d(gate_msa), v1d(shift_mlp),
      v1d(scale_mlp), gate_w, wqkv, bqkv, wproj_r, bproj)


# ----------------------------------------------------------------------------
# Kernel 3: per-expert MLP (grid = (E, B, Dh-chunks), experts outermost)
#   one-hot MXU gather of routed rows -> LN+modulate (cached) -> fc1 chunk ->
#   GELU(tanh) -> fc2 chunk (accumulated) -> * gating  -> bf16 output
# ----------------------------------------------------------------------------
def expert_mlp_kernel(idx_ref, xbf_ref, shift_ref, scale_ref, gat_ref,
                      w1_ref, b1_ref, w2_ref, b2_ref, out_ref,
                      xm_scr, acc_scr):
    ndh = pl.program_id(2)

    @pl.when(ndh == 0)
    def _():
        # One-hot MXU gather of the K routed rows (replaces K serialized row
        # copies); LN + modulate computed once per (expert, batch) and cached.
        K = idx_ref.shape[0]
        S = xbf_ref.shape[0]
        cols = lax.broadcasted_iota(jnp.int32, (K, S), 1)
        onehot = (cols == idx_ref[...]).astype(COMPUTE_DTYPE)             # (K, S)
        xg = jnp.dot(onehot, xbf_ref[...], preferred_element_type=jnp.float32)
        xm = _layernorm(xg) * (1.0 + scale_ref[...]) + shift_ref[...]
        xm_scr[...] = xm.astype(COMPUTE_DTYPE)
        acc_scr[...] = jnp.zeros_like(acc_scr)

    h = _dot_nt(xm_scr[...], w1_ref[...]) + b1_ref[...]                    # (K, tdh)
    h = _gelu_tanh(h)
    acc_scr[...] += _dot_nt(h.astype(COMPUTE_DTYPE), w2_ref[...])          # (K, D)

    @pl.when(ndh == pl.num_programs(2) - 1)
    def _():
        out_ref[...] = ((acc_scr[...] + b2_ref[...])
                        * gat_ref[...]).astype(out_ref.dtype)


def expert_mlps(index, gating, x_bf16, shift, scale, w1, b1, w2, b2, *,
                dh_tile=None):
    B, S, D = x_bf16.shape
    E, Dh, _ = w1.shape
    K = index.shape[-1]
    # dh_tile (multiple of 128) enables Dh chunking so bf16 expert weights fit
    # v7x's 64 MiB VMEM at production shapes; None = whole Dh (weights resident).
    tdh = Dh if dh_tile is None else dh_tile
    assert Dh % tdh == 0
    n_dh = Dh // tdh
    idx4 = index[..., None].astype(jnp.int32)        # (B, E, K, 1)
    gat4 = gating[..., None].astype(jnp.float32)     # (B, E, K, 1)
    flops = int(B * E * (4 * K * D * Dh + 2 * K * S * D))
    bytes_accessed = int(2 * B * E * S * D
                         + 2 * (w1.size + w2.size) * (B if n_dh > 1 else 1)
                         + 4 * (b1.size + b2.size) + 2 * B * E * K * D)
    return pl.pallas_call(
        expert_mlp_kernel,
        out_shape=jax.ShapeDtypeStruct((B, E, K, D), COMPUTE_DTYPE),
        grid=(E, B, n_dh),          # experts outermost -> weights grid-invariant in B
        in_specs=[
            pl.BlockSpec((None, None, K, 1), lambda e, b, h: (b, e, 0, 0)),   # idx
            pl.BlockSpec((None, S, D), lambda e, b, h: (b, 0, 0)),            # x (bf16)
            pl.BlockSpec((None, 1, D), lambda e, b, h: (b, 0, 0)),            # shift_mlp
            pl.BlockSpec((None, 1, D), lambda e, b, h: (b, 0, 0)),            # scale_mlp
            pl.BlockSpec((None, None, K, 1), lambda e, b, h: (b, e, 0, 0)),   # gating
            pl.BlockSpec((None, tdh, D), lambda e, b, h: (e, h, 0)),          # w1 chunk
            pl.BlockSpec((None, 1, tdh), lambda e, b, h: (e, 0, h)),          # b1 chunk
            pl.BlockSpec((None, D, tdh), lambda e, b, h: (e, 0, h)),          # w2 chunk
            pl.BlockSpec((None, 1, D), lambda e, b, h: (e, 0, 0)),            # b2
        ],
        out_specs=pl.BlockSpec((None, None, K, D), lambda e, b, h: (b, e, 0, 0)),
        scratch_shapes=[pltpu.VMEM((K, D), COMPUTE_DTYPE),   # cached LN+mod rows
                        pltpu.VMEM((K, D), jnp.float32)],    # fc2 accumulator
        compiler_params=pltpu.CompilerParams(
            dimension_semantics=("parallel", "parallel", "arbitrary"),
            vmem_limit_bytes=_vmem_limit()),
        cost_estimate=pl.CostEstimate(
            flops=flops, transcendentals=int(B * E * K * Dh),
            bytes_accessed=bytes_accessed),
    )(idx4, x_bf16, shift.reshape(B, 1, D), scale.reshape(B, 1, D), gat4,
      w1, b1, w2, b2)


# ----------------------------------------------------------------------------
# Kernel 4: MoE combine -- one-hot MXU scatter of expert outputs (per S-tile)
#           + gated residual.
# ----------------------------------------------------------------------------
def moe_combine_kernel(idx_ref, xe_ref, x_ref, gmlp_ref, out_ref):
    E, K = idx_ref.shape
    ts, D = x_ref.shape
    base = pl.program_id(1) * ts
    rows = base + lax.broadcasted_iota(jnp.int32, (ts, K), 0)       # global token ids
    acc = jnp.zeros((ts, D), jnp.float32)
    for e in range(E):          # static; one MXU scatter matmul per expert
        onehot = (rows == idx_ref[pl.ds(e, 1), :]).astype(COMPUTE_DTYPE)   # (ts, K)
        acc = acc + jnp.dot(onehot, xe_ref[e], preferred_element_type=jnp.float32)
    out_ref[...] = x_ref[...] + gmlp_ref[...] * acc


def moe_combine(index, x_e, x, gate_mlp, *, seq_tile=256):
    B, E, K, D = x_e.shape
    S = x.shape[1]
    ts = S if S <= seq_tile else seq_tile
    assert S % ts == 0
    return pl.pallas_call(
        moe_combine_kernel,
        out_shape=jax.ShapeDtypeStruct((B, S, D), jnp.float32),
        grid=(B, S // ts),
        in_specs=[
            pl.BlockSpec((None, E, K), lambda b, s: (b, 0, 0)),           # index
            pl.BlockSpec((None, E, K, D), lambda b, s: (b, 0, 0, 0)),     # x_e (bf16)
            pl.BlockSpec((None, ts, D), lambda b, s: (b, s, 0)),          # residual x
            pl.BlockSpec((None, 1, D), lambda b, s: (b, 0, 0)),           # gate_mlp
        ],
        out_specs=pl.BlockSpec((None, ts, D), lambda b, s: (b, s, 0)),
        compiler_params=pltpu.CompilerParams(
            dimension_semantics=("parallel", "parallel"),
            vmem_limit_bytes=_vmem_limit()),
    )(index.astype(jnp.int32), x_e, x, gate_mlp.reshape(gate_mlp.shape[0], 1, D))


# ----------------------------------------------------------------------------
# DiTBlock forward (Pallas)
# ----------------------------------------------------------------------------
def dit_block_forward(x, c, params, num_experts, capacity):
    B, S, D = x.shape

    mod = adaln_modulation(c, params["adaln_w"], params["adaln_b"])   # (6, B, D)
    shift_msa, scale_msa, gate_msa = mod[0], mod[1], mod[2]
    shift_mlp, scale_mlp, gate_mlp = mod[3], mod[4], mod[5]

    # attention branch + router logits (fused epilogue)
    x, x_bf16, logits = fused_attention_router(
        x, shift_msa, scale_msa, gate_msa, shift_mlp, scale_mlp,
        params["gate_w"], params["wqkv"], params["bqkv"],
        params["wproj_r"], params["bproj"])

    affinity = jax.nn.softmax(logits, axis=1)               # softmax over experts
    k_cap = int(S / num_experts * capacity)
    # TODO(synk): top-k token routing stays in plain JAX (no Pallas top-k primitive).
    gating, index = lax.top_k(affinity, k_cap)              # (B, E, k)

    x_e = expert_mlps(index, gating, x_bf16, shift_mlp, scale_mlp,
                      params["w1"], params["b1"], params["w2"], params["b2"])
    return moe_combine(index, x_e, x, gate_mlp)


# ----------------------------------------------------------------------------
# Pure-JAX reference (mirrors the PyTorch forward semantics, f32)
# ----------------------------------------------------------------------------
def dit_block_reference(x, c, params, num_heads, num_experts, capacity):
    B, S, D = x.shape
    hd = D // num_heads

    silu = c * jax.nn.sigmoid(c)
    mod = silu @ params["adaln_w"].T + params["adaln_b"]
    (shift_msa, scale_msa, gate_msa,
     shift_mlp, scale_mlp, gate_mlp) = jnp.split(mod, 6, axis=1)

    def ln(t):
        mu = t.mean(-1, keepdims=True)
        var = ((t - mu) ** 2).mean(-1, keepdims=True)
        return (t - mu) / jnp.sqrt(var + 1e-6)

    def modulate(t, shift, scale):
        return t * (1.0 + scale[:, None, :]) + shift[:, None, :]

    # attention
    xm = modulate(ln(x), shift_msa, scale_msa)
    qkv = xm @ params["wqkv"].T + params["bqkv"]
    qkv = qkv.reshape(B, S, 3, num_heads, hd).transpose(2, 0, 3, 1, 4)
    q, k, v = qkv[0], qkv[1], qkv[2]
    attn = jax.nn.softmax((q @ jnp.swapaxes(k, -1, -2)) * (hd ** -0.5), axis=-1)
    a = (attn @ v).transpose(0, 2, 1, 3).reshape(B, S, D)
    a = a @ params["wproj"].T + params["bproj"]
    x = x + gate_msa[:, None, :] * a

    # SparseMoE
    xm = modulate(ln(x), shift_mlp, scale_mlp)
    logits = xm @ params["gate_w"].T
    affinity = jnp.transpose(jax.nn.softmax(logits, -1), (0, 2, 1))
    k_cap = int(S / num_experts * capacity)
    gating, index = lax.top_k(affinity, k_cap)
    dispatch = jax.nn.one_hot(index, S, dtype=x.dtype)
    x_in = jnp.einsum("becs,bsd->becd", dispatch, xm)
    outs = []
    for e in range(num_experts):
        h = x_in[:, e] @ params["w1"][e].T + params["b1"][e]
        h = 0.5 * h * (1.0 + jnp.tanh(GELU_C0 * (h + 0.044715 * h ** 3)))
        outs.append(h @ params["w2"][e].T + params["b2"][e])
    x_e = jnp.stack(outs, axis=1)
    x_out = jnp.einsum("becs,bec,becd->bsd", dispatch, gating, x_e)
    return x + gate_mlp[:, None, :] * x_out


# ----------------------------------------------------------------------------
# Main
# ----------------------------------------------------------------------------
if __name__ == "__main__":
    B, S, D = 2, 16, 32
    H = 4                      # num_heads  (head_dim = 8)
    MLP_RATIO = 4.0
    DH = int(D * MLP_RATIO)    # 128
    E = 4                      # num_experts
    CAP = 2                    # capacity  -> k = int(S/E*CAP) = 8
    # n_shared_experts = 0 (no shared MoeMLP branch)

    key = jax.random.PRNGKey(0)
    ks = jax.random.split(key, 13)

    params = {
        "adaln_w": 0.02 * jax.random.normal(ks[0], (6 * D, D), jnp.float32),
        "adaln_b": 0.02 * jax.random.normal(ks[1], (1, 6 * D), jnp.float32),
        "wqkv":    0.02 * jax.random.normal(ks[2], (3 * D, D), jnp.float32),
        "bqkv":    0.02 * jax.random.normal(ks[3], (1, 3 * D), jnp.float32),
        "wproj":   0.02 * jax.random.normal(ks[4], (D, D), jnp.float32),
        "bproj":   0.02 * jax.random.normal(ks[5], (1, D), jnp.float32),
        "gate_w":  0.006 * jax.random.normal(ks[6], (E, D), jnp.float32),
        "w1":      0.02 * jax.random.normal(ks[7], (E, DH, D), jnp.float32),
        "b1":      0.02 * jax.random.normal(ks[8], (E, 1, DH), jnp.float32),
        "w2":      0.02 * jax.random.normal(ks[9], (E, D, DH), jnp.float32),
        "b2":      0.02 * jax.random.normal(ks[10], (E, 1, D), jnp.float32),
    }

    x = jax.random.normal(ks[11], (B, S, D), jnp.float32)
    c = jax.random.normal(ks[12], (B, D), jnp.float32)

    pparams = prepare_params(params, H)        # bf16 weights, head-major out-proj

    fwd = jax.jit(functools.partial(dit_block_forward, num_experts=E, capacity=CAP))
    out = jax.block_until_ready(fwd(x, c, pparams))

    with jax.default_matmul_precision("highest"):
        ref = jax.block_until_ready(
            dit_block_reference(x, c, params, H, E, CAP))

    assert out.shape == (B, S, D)
    assert bool(jnp.all(jnp.isfinite(out)))
    # bf16 MXU operands + approx reciprocal in the kernels vs. full-f32 reference
    assert bool(jnp.allclose(out, ref, atol=5e-3, rtol=5e-3)), (
        f"max abs diff {float(jnp.max(jnp.abs(out - ref)))}")

    print("KERNEL_OK")
</pallas_src>

<mosaic_0001>
module attributes {stable_mosaic.version = 11 : i64} {
  func.func @adaln_kernel(%arg0: i32, %arg1: memref<2x32xf32, #tpu.memory_space<vmem>>, %arg2: memref<1x32x32xbf16, #tpu.memory_space<vmem>>, %arg3: memref<1x1x32xf32, #tpu.memory_space<vmem>>, %arg4: memref<1x2x32xf32, #tpu.memory_space<vmem>>) attributes {dimension_semantics = [#tpu.dimension_semantics<parallel>], iteration_bounds = array<i64: 6>, scalar_prefetch = 0 : i64, scratch_operands = 0 : i64, tpu.core_type = #tpu.core_type<tc>, window_params = [{pipeline_mode = #tpu.pipeline_mode<synchronous>, transform_indices = @transform_0, window_bounds = array<i64: 2, 32>}, {transform_indices = @transform_1, window_bounds = array<i64: 1, 32, 32>}, {transform_indices = @transform_2, window_bounds = array<i64: 1, 1, 32>}, {transform_indices = @transform_3, window_bounds = array<i64: 1, 2, 32>}]} {
    %c0 = arith.constant 0 : index
    %c0_0 = arith.constant 0 : index
    %0 = vector.load %arg1[%c0, %c0_0] : memref<2x32xf32, #tpu.memory_space<vmem>>, vector<2x32xf32>
    %1 = arith.negf %0 : vector<2x32xf32>
    %2 = math.exp %1 : vector<2x32xf32>
    %cst = arith.constant 1.000000e+00 : f32
    %3 = vector.broadcast %cst : f32 to vector<2x32xf32>
    %4 = arith.addf %3, %2 : vector<2x32xf32>
    %5 = arith.divf %3, %4 : vector<2x32xf32>
    %6 = arith.mulf %0, %5 : vector<2x32xf32>
    %7 = arith.truncf %6 : vector<2x32xf32> to vector<2x32xbf16>
    %c0_1 = arith.constant 0 : index
    %c0_2 = arith.constant 0 : index
    %c0_3 = arith.constant 0 : index
    %8 = vector.load %arg2[%c0_1, %c0_2, %c0_3] : memref<1x32x32xbf16, #tpu.memory_space<vmem>>, vector<1x32x32xbf16>
    %9 = vector.shape_cast %8 : vector<1x32x32xbf16> to vector<32x32xbf16>
    %cst_4 = arith.constant dense<0.000000e+00> : vector<2x32xf32>
    %10 = tpu.matmul %7, %9, %cst_4 {dimension_numbers = #tpu.dot_dimension_numbers<[1], [1], [0], [0], [0, 0, 1, 0], [], []>} : vector<2x32xbf16>, vector<32x32xbf16>, vector<2x32xf32> -> vector<2x32xf32>
    %c0_5 = arith.constant 0 : index
    %c0_6 = arith.constant 0 : index
    %c0_7 = arith.constant 0 : index
    %11 = vector.load %arg3[%c0_5, %c0_6, %c0_7] : memref<1x1x32xf32, #tpu.memory_space<vmem>>, vector<1x1x32xf32>
    %12 = vector.shape_cast %11 : vector<1x1x32xf32> to vector<1x32xf32>
    %13 = vector.broadcast %12 : vector<1x32xf32> to vector<2x32xf32>
    %14 = arith.addf %10, %13 : vector<2x32xf32>
    %c0_8 = arith.constant 0 : index
    %c0_9 = arith.constant 0 : index
    %c0_10 = arith.constant 0 : index
    %15 = vector.load %arg4[%c0_8, %c0_9, %c0_10] : memref<1x2x32xf32, #tpu.memory_space<vmem>>, vector<1x2x32xf32>
    %16 = vector.shape_cast %15 : vector<1x2x32xf32> to vector<2x32xf32>
    %17 = vector.shape_cast %14 : vector<2x32xf32> to vector<1x2x32xf32>
    tpu.vector_store %arg4[%c0_8, %c0_9, %c0_10], %17 {strides = array<i32>} : memref<1x2x32xf32, #tpu.memory_space<vmem>>, vector<1x2x32xf32>,
    return
  }
  func.func @transform_0(%arg0: i32) -> (i32, i32) {
    %c0_i32 = arith.constant 0 : i32
    %c0_i32_0 = arith.constant 0 : i32
    %c0_i32_1 = arith.constant 0 : i32
    return %c0_i32, %c0_i32_0 : i32, i32
  }
  func.func @transform_1(%arg0: i32) -> (i32, i32, i32) {
    %c0_i32 = arith.constant 0 : i32
    %c0_i32_0 = arith.constant 0 : i32
    %c0_i32_1 = arith.constant 0 : i32
    return %arg0, %c0_i32, %c0_i32_0 : i32, i32, i32
  }
  func.func @transform_2(%arg0: i32) -> (i32, i32, i32) {
    %c0_i32 = arith.constant 0 : i32
    %c0_i32_0 = arith.constant 0 : i32
    %c0_i32_1 = arith.constant 0 : i32
    return %arg0, %c0_i32, %c0_i32_0 : i32, i32, i32
  }
  func.func @transform_3(%arg0: i32) -> (i32, i32, i32) {
    %c0_i32 = arith.constant 0 : i32
    %c0_i32_0 = arith.constant 0 : i32
    %c0_i32_1 = arith.constant 0 : i32
    return %arg0, %c0_i32, %c0_i32_0 : i32, i32, i32
  }
}

module attributes {stable_mosaic.version = 11 : i64} {
  func.func @attn_router_kernel(%arg0: i32, %arg1: memref<1x16x32xf32, #tpu.memory_space<vmem>>, %arg2: memref<1x1x32xf32, #tpu.memory_space<vmem>>, %arg3: memref<1x1x32xf32, #tpu.memory_space<vmem>>, %arg4: memref<1x1x32xf32, #tpu.memory_space<vmem>>, %arg5: memref<1x1x32xf32, #tpu.memory_space<vmem>>, %arg6: memref<1x1x32xf32, #tpu.memory_space<vmem>>, %arg7: memref<4x32xf32, #tpu.memory_space<vmem>>, %arg8: memref<96x32xbf16, #tpu.memory_space<vmem>>, %arg9: memref<1x96xf32, #tpu.memory_space<vmem>>, %arg10: memref<4x8x32xbf16, #tpu.memory_space<vmem>>, %arg11: memref<1x32xf32, #tpu.memory_space<vmem>>, %arg12: memref<1x16x32xf32, #tpu.memory_space<vmem>>, %arg13: memref<1x16x32xbf16, #tpu.memory_space<vmem>>, %arg14: memref<1x4x16xf32, #tpu.memory_space<vmem>>) attributes {dimension_semantics = [#tpu.dimension_semantics<parallel>], iteration_bounds = array<i64: 2>, scalar_prefetch = 0 : i64, scratch_operands = 0 : i64, tpu.core_type = #tpu.core_type<tc>, window_params = [{transform_indices = @transform_0, window_bounds = array<i64: 1, 16, 32>}, {transform_indices = @transform_1, window_bounds = array<i64: 1, 1, 32>}, {transform_indices = @transform_2, window_bounds = array<i64: 1, 1, 32>}, {transform_indices = @transform_3, window_bounds = array<i64: 1, 1, 32>}, {transform_indices = @transform_4, window_bounds = array<i64: 1, 1, 32>}, {transform_indices = @transform_5, window_bounds = array<i64: 1, 1, 32>}, {pipeline_mode = #tpu.pipeline_mode<synchronous>, transform_indices = @transform_6, window_bounds = array<i64: 4, 32>}, {pipeline_mode = #tpu.pipeline_mode<synchronous>, transform_indices = @transform_7, window_bounds = array<i64: 96, 32>}, {pipeline_mode = #tpu.pipeline_mode<synchronous>, transform_indices = @transform_8, window_bounds = array<i64: 1, 96>}, {pipeline_mode = #tpu.pipeline_mode<synchronous>, transform_indices = @transform_9, window_bounds = array<i64: 4, 8, 32>}, {pipeline_mode = #tpu.pipeline_mode<synchronous>, transform_indices = @transform_10, window_bounds = array<i64: 1, 32>}, {transform_indices = @transform_11, window_bounds = array<i64: 1, 16, 32>}, {transform_indices = @transform_12, window_bounds = array<i64: 1, 16, 32>}, {transform_indices = @transform_13, window_bounds = array<i64: 1, 4, 16>}]} {
    %c0 = arith.constant 0 : index
    %c0_0 = arith.constant 0 : index
    %c0_1 = arith.constant 0 : index
    %0 = vector.load %arg1[%c0, %c0_0, %c0_1] : memref<1x16x32xf32, #tpu.memory_space<vmem>>, vector<1x16x32xf32>
    %1 = vector.shape_cast %0 : vector<1x16x32xf32> to vector<16x32xf32>
    %cst = arith.constant dense<0.000000e+00> : vector<16xf32>
    %2 = vector.multi_reduction <add>, %1, %cst [1] : vector<16x32xf32> to vector<16xf32>
    %3 = vector.shape_cast %2 : vector<16xf32> to vector<16x1xf32>
    %cst_2 = arith.constant 3.200000e+01 : f32
    %4 = vector.broadcast %cst_2 : f32 to vector<16x1xf32>
    %5 = arith.divf %3, %4 : vector<16x1xf32>
    %6 = vector.broadcast %5 : vector<16x1xf32> to vector<16x32xf32>
    %7 = arith.subf %1, %6 : vector<16x32xf32>
    %8 = arith.mulf %7, %7 : vector<16x32xf32>
    %cst_3 = arith.constant dense<0.000000e+00> : vector<16xf32>
    %9 = vector.multi_reduction <add>, %8, %cst_3 [1] : vector<16x32xf32> to vector<16xf32>
    %10 = vector.shape_cast %9 : vector<16xf32> to vector<16x1xf32>
    %cst_4 = arith.constant 3.200000e+01 : f32
    %11 = vector.broadcast %cst_4 : f32 to vector<16x1xf32>
    %12 = arith.divf %10, %11 : vector<16x1xf32>
    %13 = vector.broadcast %5 : vector<16x1xf32> to vector<16x32xf32>
    %14 = arith.subf %1, %13 : vector<16x32xf32>
    %cst_5 = arith.constant 9.99999997E-7 : f32
    %15 = vector.broadcast %cst_5 : f32 to vector<16x1xf32>
    %16 = arith.addf %12, %15 : vector<16x1xf32>
    %17 = math.rsqrt %16 : vector<16x1xf32>
    %18 = vector.broadcast %17 : vector<16x1xf32> to vector<16x32xf32>
    %19 = arith.mulf %14, %18 : vector<16x32xf32>
    %c0_6 = arith.constant 0 : index
    %c0_7 = arith.constant 0 : index
    %c0_8 = arith.constant 0 : index
    %20 = vector.load %arg3[%c0_6, %c0_7, %c0_8] : memref<1x1x32xf32, #tpu.memory_space<vmem>>, vector<1x1x32xf32>
    %21 = vector.shape_cast %20 : vector<1x1x32xf32> to vector<1x32xf32>
    %cst_9 = arith.constant 1.000000e+00 : f32
    %22 = vector.broadcast %cst_9 : f32 to vector<1x32xf32>
    %23 = arith.addf %22, %21 : vector<1x32xf32>
    %24 = vector.broadcast %23 : vector<1x32xf32> to vector<16x32xf32>
    %25 = arith.mulf %19, %24 : vector<16x32xf32>
    %c0_10 = arith.constant 0 : index
    %c0_11 = arith.constant 0 : index
    %c0_12 = arith.constant 0 : index
    %26 = vector.load %arg2[%c0_10, %c0_11, %c0_12] : memref<1x1x32xf32, #tpu.memory_space<vmem>>, vector<1x1x32xf32>
    %27 = vector.shape_cast %26 : vector<1x1x32xf32> to vector<1x32xf32>
    %28 = vector.broadcast %27 : vector<1x32xf32> to vector<16x32xf32>
    %29 = arith.addf %25, %28 : vector<16x32xf32>
    %30 = arith.truncf %29 : vector<16x32xf32> to vector<16x32xbf16>
    %c0_13 = arith.constant 0 : index
    %c0_14 = arith.constant 0 : index
    %31 = vector.load %arg8[%c0_13, %c0_14] : memref<96x32xbf16, #tpu.memory_space<vmem>>, vector<96x32xbf16>
    %cst_15 = arith.constant dense<0.000000e+00> : vector<16x96xf32>
    %32 = tpu.matmul %30, %31, %cst_15 {dimension_numbers = #tpu.dot_dimension_numbers<[1], [1], [0], [0], [0, 0, 1, 0], [], []>} : vector<16x32xbf16>, vector<96x32xbf16>, vector<16x96xf32> -> vector<16x96xf32>
    %c0_16 = arith.constant 0 : index
    %c0_17 = arith.constant 0 : index
    %33 = vector.load %arg9[%c0_16, %c0_17] : memref<1x96xf32, #tpu.memory_space<vmem>>, vector<1x96xf32>
    %34 = vector.broadcast %33 : vector<1x96xf32> to vector<16x96xf32>
    %35 = arith.addf %32, %34 : vector<16x96xf32>
    %36 = vector.extract_strided_slice %35 {offsets = [0, 0], sizes = [16, 32], strides = [1, 1]} : vector<16x96xf32> to vector<16x32xf32>
    %cst_18 = arith.constant 0.353553385 : f32
    %37 = vector.broadcast %cst_18 : f32 to vector<16x32xf32>
    %38 = arith.mulf %36, %37 : vector<16x32xf32>
    %39 = arith.truncf %38 : vector<16x32xf32> to vector<16x32xbf16>
    %40 = vector.shape_cast %39 : vector<16x32xbf16> to vector<16x4x8xbf16>
    %41 = tpu.transpose %40, [1, 0, 2] : vector<16x4x8xbf16> -> vector<4x16x8xbf16>
    %42 = vector.extract_strided_slice %35 {offsets = [0, 32], sizes = [16, 32], strides = [1, 1]} : vector<16x96xf32> to vector<16x32xf32>
    %43 = arith.truncf %42 : vector<16x32xf32> to vector<16x32xbf16>
    %44 = vector.shape_cast %43 : vector<16x32xbf16> to vector<16x4x8xbf16>
    %45 = tpu.transpose %44, [1, 0, 2] : vector<16x4x8xbf16> -> vector<4x16x8xbf16>
    %46 = vector.extract_strided_slice %35 {offsets = [0, 64], sizes = [16, 32], strides = [1, 1]} : vector<16x96xf32> to vector<16x32xf32>
    %47 = arith.truncf %46 : vector<16x32xf32> to vector<16x32xbf16>
    %48 = vector.shape_cast %47 : vector<16x32xbf16> to vector<16x4x8xbf16>
    %49 = tpu.transpose %48, [1, 0, 2] : vector<16x4x8xbf16> -> vector<4x16x8xbf16>
    "tpu.trace_start"() <{level = 10 : i32, message = "hqd,hkd->hqk"}> : () -> ()
    %cst_19 = arith.constant dense<0.000000e+00> : vector<4x16x16xf32>
    %50 = tpu.matmul %41, %45, %cst_19 {dimension_numbers = #tpu.dot_dimension_numbers<[2], [2], [1], [1], [0, 0, 0, 1, 1, 1], [0], [0]>} : vector<4x16x8xbf16>, vector<4x16x8xbf16>, vector<4x16x16xf32> -> vector<4x16x16xf32>
    "tpu.trace_stop"() : () -> ()
    %cst_20 = arith.constant dense<0xFF800000> : vector<4x16xf32>
    %51 = vector.multi_reduction <maximumf>, %50, %cst_20 [2] : vector<4x16x16xf32> to vector<4x16xf32>
    %52 = vector.shape_cast %51 : vector<4x16xf32> to vector<4x16x1xf32>
    %53 = vector.broadcast %52 : vector<4x16x1xf32> to vector<4x16x16xf32>
    %54 = arith.subf %50, %53 : vector<4x16x16xf32>
    %55 = math.exp %54 : vector<4x16x16xf32>
    %cst_21 = arith.constant dense<0.000000e+00> : vector<4x16xf32>
    %56 = vector.multi_reduction <add>, %55, %cst_21 [2] : vector<4x16x16xf32> to vector<4x16xf32>
    %57 = vector.shape_cast %56 : vector<4x16xf32> to vector<4x16x1xf32>
    %58 = tpu.reciprocal %57 {approx = true} : vector<4x16x1xf32> -> vector<4x16x1xf32>
    %59 = vector.broadcast %58 : vector<4x16x1xf32> to vector<4x16x16xf32>
    %60 = arith.mulf %55, %59 : vector<4x16x16xf32>
    %61 = arith.truncf %60 : vector<4x16x16xf32> to vector<4x16x16xbf16>
    "tpu.trace_start"() <{level = 10 : i32, message = "hqk,hkd->hqd"}> : () -> ()
    %cst_22 = arith.constant dense<0.000000e+00> : vector<4x16x8xf32>
    %62 = tpu.matmul %61, %49, %cst_22 {dimension_numbers = #tpu.dot_dimension_numbers<[2], [1], [1], [2], [0, 0, 0, 1, 1, 2], [0], [0]>} : vector<4x16x16xbf16>, vector<4x16x8xbf16>, vector<4x16x8xf32> -> vector<4x16x8xf32>
    "tpu.trace_stop"() : () -> ()
    %63 = arith.truncf %62 : vector<4x16x8xf32> to vector<4x16x8xbf16>
    %c0_23 = arith.constant 0 : index
    %c0_24 = arith.constant 0 : index
    %c0_25 = arith.constant 0 : index
    %64 = vector.load %arg10[%c0_23, %c0_24, %c0_25] : memref<4x8x32xbf16, #tpu.memory_space<vmem>>, vector<4x8x32xbf16>
    "tpu.trace_start"() <{level = 10 : i32, message = "hsd,hdo->hso"}> : () -> ()
    %cst_26 = arith.constant dense<0.000000e+00> : vector<4x16x32xf32>
    %65 = tpu.matmul %63, %64, %cst_26 {dimension_numbers = #tpu.dot_dimension_numbers<[2], [1], [1], [2], [0, 0, 0, 1, 1, 2], [0], [0]>} : vector<4x16x8xbf16>, vector<4x8x32xbf16>, vector<4x16x32xf32> -> vector<4x16x32xf32>
    "tpu.trace_stop"() : () -> ()
    %cst_27 = arith.constant dense<0.000000e+00> : vector<16x32xf32>
    %66 = vector.multi_reduction <add>, %65, %cst_27 [0] : vector<4x16x32xf32> to vector<16x32xf32>
    %c0_28 = arith.constant 0 : index
    %c0_29 = arith.constant 0 : index
    %67 = vector.load %arg11[%c0_28, %c0_29] : memref<1x32xf32, #tpu.memory_space<vmem>>, vector<1x32xf32>
    %68 = vector.broadcast %67 : vector<1x32xf32> to vector<16x32xf32>
    %69 = arith.addf %66, %68 : vector<16x32xf32>
    %c0_30 = arith.constant 0 : index
    %c0_31 = arith.constant 0 : index
    %c0_32 = arith.constant 0 : index
    %70 = vector.load %arg4[%c0_30, %c0_31, %c0_32] : memref<1x1x32xf32, #tpu.memory_space<vmem>>, vector<1x1x32xf32>
    %71 = vector.shape_cast %70 : vector<1x1x32xf32> to vector<1x32xf32>
    %72 = vector.broadcast %71 : vector<1x32xf32> to vector<16x32xf32>
    %73 = arith.mulf %72, %69 : vector<16x32xf32>
    %74 = arith.addf %1, %73 : vector<16x32xf32>
    %c0_33 = arith.constant 0 : index
    %c0_34 = arith.constant 0 : index
    %c0_35 = arith.constant 0 : index
    %75 = vector.load %arg12[%c0_33, %c0_34, %c0_35] : memref<1x16x32xf32, #tpu.memory_space<vmem>>, vector<1x16x32xf32>
    %76 = vector.shape_cast %75 : vector<1x16x32xf32> to vector<16x32xf32>
    %77 = vector.shape_cast %74 : vector<16x32xf32> to vector<1x16x32xf32>
    tpu.vector_store %arg12[%c0_33, %c0_34, %c0_35], %77 {strides = array<i32>} : memref<1x16x32xf32, #tpu.memory_space<vmem>>, vector<1x16x32xf32>,
    %78 = arith.truncf %74 : vector<16x32xf32> to vector<16x32xbf16>
    %c0_36 = arith.constant 0 : index
    %c0_37 = arith.constant 0 : index
    %c0_38 = arith.constant 0 : index
    %79 = vector.load %arg13[%c0_36, %c0_37, %c0_38] : memref<1x16x32xbf16, #tpu.memory_space<vmem>>, vector<1x16x32xbf16>
    %80 = vector.shape_cast %79 : vector<1x16x32xbf16> to vector<16x32xbf16>
    %81 = vector.shape_cast %78 : vector<16x32xbf16> to vector<1x16x32xbf16>
    tpu.vector_store %arg13[%c0_36, %c0_37, %c0_38], %81 {strides = array<i32>} : memref<1x16x32xbf16, #tpu.memory_space<vmem>>, vector<1x16x32xbf16>,
    %cst_39 = arith.constant dense<0.000000e+00> : vector<16xf32>
    %82 = vector.multi_reduction <add>, %74, %cst_39 [1] : vector<16x32xf32> to vector<16xf32>
    %83 = vector.shape_cast %82 : vector<16xf32> to vector<16x1xf32>
    %cst_40 = arith.constant 3.200000e+01 : f32
    %84 = vector.broadcast %cst_40 : f32 to vector<16x1xf32>
    %85 = arith.divf %83, %84 : vector<16x1xf32>
    %86 = vector.broadcast %85 : vector<16x1xf32> to vector<16x32xf32>
    %87 = arith.subf %74, %86 : vector<16x32xf32>
    %88 = arith.mulf %87, %87 : vector<16x32xf32>
    %cst_41 = arith.constant dense<0.000000e+00> : vector<16xf32>
    %89 = vector.multi_reduction <add>, %88, %cst_41 [1] : vector<16x32xf32> to vector<16xf32>
    %90 = vector.shape_cast %89 : vector<16xf32> to vector<16x1xf32>
    %cst_42 = arith.constant 3.200000e+01 : f32
    %91 = vector.broadcast %cst_42 : f32 to vector<16x1xf32>
    %92 = arith.divf %90, %91 : vector<16x1xf32>
    %93 = vector.broadcast %85 : vector<16x1xf32> to vector<16x32xf32>
    %94 = arith.subf %74, %93 : vector<16x32xf32>
    %cst_43 = arith.constant 9.99999997E-7 : f32
    %95 = vector.broadcast %cst_43 : f32 to vector<16x1xf32>
    %96 = arith.addf %92, %95 : vector<16x1xf32>
    %97 = math.rsqrt %96 : vector<16x1xf32>
    %98 = vector.broadcast %97 : vector<16x1xf32> to vector<16x32xf32>
    %99 = arith.mulf %94, %98 : vector<16x32xf32>
    %c0_44 = arith.constant 0 : index
    %c0_45 = arith.constant 0 : index
    %c0_46 = arith.constant 0 : index
    %100 = vector.load %arg6[%c0_44, %c0_45, %c0_46] : memref<1x1x32xf32, #tpu.memory_space<vmem>>, vector<1x1x32xf32>
    %101 = vector.shape_cast %100 : vector<1x1x32xf32> to vector<1x32xf32>
    %cst_47 = arith.constant 1.000000e+00 : f32
    %102 = vector.broadcast %cst_47 : f32 to vector<1x32xf32>
    %103 = arith.addf %102, %101 : vector<1x32xf32>
    %104 = vector.broadcast %103 : vector<1x32xf32> to vector<16x32xf32>
    %105 = arith.mulf %99, %104 : vector<16x32xf32>
    %c0_48 = arith.constant 0 : index
    %c0_49 = arith.constant 0 : index
    %c0_50 = arith.constant 0 : index
    %106 = vector.load %arg5[%c0_48, %c0_49, %c0_50] : memref<1x1x32xf32, #tpu.memory_space<vmem>>, vector<1x1x32xf32>
    %107 = vector.shape_cast %106 : vector<1x1x32xf32> to vector<1x32xf32>
    %108 = vector.broadcast %107 : vector<1x32xf32> to vector<16x32xf32>
    %109 = arith.addf %105, %108 : vector<16x32xf32>
    %c0_51 = arith.constant 0 : index
    %c0_52 = arith.constant 0 : index
    %110 = vector.load %arg7[%c0_51, %c0_52] : memref<4x32xf32, #tpu.memory_space<vmem>>, vector<4x32xf32>
    %cst_53 = arith.constant dense<0.000000e+00> : vector<4x16xf32>
    %111 = tpu.matmul %110, %109, %cst_53 {dimension_numbers = #tpu.dot_dimension_numbers<[1], [1], [0], [0], [0, 0, 1, 0], [], []>} : vector<4x32xf32>, vector<16x32xf32>, vector<4x16xf32> -> vector<4x16xf32>
    %c0_54 = arith.constant 0 : index
    %c0_55 = arith.constant 0 : index
    %c0_56 = arith.constant 0 : index
    %112 = vector.load %arg14[%c0_54, %c0_55, %c0_56] : memref<1x4x16xf32, #tpu.memory_space<vmem>>, vector<1x4x16xf32>
    %113 = vector.shape_cast %112 : vector<1x4x16xf32> to vector<4x16xf32>
    %114 = vector.shape_cast %111 : vector<4x16xf32> to vector<1x4x16xf32>
    tpu.vector_store %arg14[%c0_54, %c0_55, %c0_56], %114 {strides = array<i32>} : memref<1x4x16xf32, #tpu.memory_space<vmem>>, vector<1x4x16xf32>,
    return
  }
  func.func @transform_0(%arg0: i32) -> (i32, i32, i32) {
    %c0_i32 = arith.constant 0 : i32
    %c0_i32_0 = arith.constant 0 : i32
    %c0_i32_1 = arith.constant 0 : i32
    return %arg0, %c0_i32, %c0_i32_0 : i32, i32, i32
  }
  func.func @transform_1(%arg0: i32) -> (i32, i32, i32) {
    %c0_i32 = arith.constant 0 : i32
    %c0_i32_0 = arith.constant 0 : i32
    %c0_i32_1 = arith.constant 0 : i32
    return %arg0, %c0_i32, %c0_i32_0 : i32, i32, i32
  }
  func.func @transform_2(%arg0: i32) -> (i32, i32, i32) {
    %c0_i32 = arith.constant 0 : i32
    %c0_i32_0 = arith.constant 0 : i32
    %c0_i32_1 = arith.constant 0 : i32
    return %arg0, %c0_i32, %c0_i32_0 : i32, i32, i32
  }
  func.func @transform_3(%arg0: i32) -> (i32, i32, i32) {
    %c0_i32 = arith.constant 0 : i32
    %c0_i32_0 = arith.constant 0 : i32
    %c0_i32_1 = arith.constant 0 : i32
    return %arg0, %c0_i32, %c0_i32_0 : i32, i32, i32
  }
  func.func @transform_4(%arg0: i32) -> (i32, i32, i32) {
    %c0_i32 = arith.constant 0 : i32
    %c0_i32_0 = arith.constant 0 : i32
    %c0_i32_1 = arith.constant 0 : i32
    return %arg0, %c0_i32, %c0_i32_0 : i32, i32, i32
  }
  func.func @transform_5(%arg0: i32) -> (i32, i32, i32) {
    %c0_i32 = arith.constant 0 : i32
    %c0_i32_0 = arith.constant 0 : i32
    %c0_i32_1 = arith.constant 0 : i32
    return %arg0, %c0_i32, %c0_i32_0 : i32, i32, i32
  }
  func.func @transform_6(%arg0: i32) -> (i32, i32) {
    %c0_i32 = arith.constant 0 : i32
    %c0_i32_0 = arith.constant 0 : i32
    %c0_i32_1 = arith.constant 0 : i32
    return %c0_i32, %c0_i32_0 : i32, i32
  }
  func.func @transform_7(%arg0: i32) -> (i32, i32) {
    %c0_i32 = arith.constant 0 : i32
    %c0_i32_0 = arith.constant 0 : i32
    %c0_i32_1 = arith.constant 0 : i32
    return %c0_i32, %c0_i32_0 : i32, i32
  }
  func.func @transform_8(%arg0: i32) -> (i32, i32) {
    %c0_i32 = arith.constant 0 : i32
    %c0_i32_0 = arith.constant 0 : i32
    %c0_i32_1 = arith.constant 0 : i32
    return %c0_i32, %c0_i32_0 : i32, i32
  }
  func.func @transform_9(%arg0: i32) -> (i32, i32, i32) {
    %c0_i32 = arith.constant 0 : i32
    %c0_i32_0 = arith.constant 0 : i32
    %c0_i32_1 = arith.constant 0 : i32
    %c0_i32_2 = arith.constant 0 : i32
    return %c0_i32, %c0_i32_0, %c0_i32_1 : i32, i32, i32
  }
  func.func @transform_10(%arg0: i32) -> (i32, i32) {
    %c0_i32 = arith.constant 0 : i32
    %c0_i32_0 = arith.constant 0 : i32
    %c0_i32_1 = arith.constant 0 : i32
    return %c0_i32, %c0_i32_0 : i32, i32
  }
  func.func @transform_11(%arg0: i32) -> (i32, i32, i32) {
    %c0_i32 = arith.constant 0 : i32
    %c0_i32_0 = arith.constant 0 : i32
    %c0_i32_1 = arith.constant 0 : i32
    return %arg0, %c0_i32, %c0_i32_0 : i32, i32, i32
  }
  func.func @transform_12(%arg0: i32) -> (i32, i32, i32) {
    %c0_i32 = arith.constant 0 : i32
    %c0_i32_0 = arith.constant 0 : i32
    %c0_i32_1 = arith.constant 0 : i32
    return %arg0, %c0_i32, %c0_i32_0 : i32, i32, i32
  }
  func.func @transform_13(%arg0: i32) -> (i32, i32, i32) {
    %c0_i32 = arith.constant 0 : i32
    %c0_i32_0 = arith.constant 0 : i32
    %c0_i32_1 = arith.constant 0 : i32
    return %arg0, %c0_i32, %c0_i32_0 : i32, i32, i32
  }
}

module attributes {stable_mosaic.version = 11 : i64} {
  func.func @expert_mlp_kernel(%arg0: i32, %arg1: i32, %arg2: i32, %arg3: memref<1x1x8x1xi32, #tpu.memory_space<vmem>>, %arg4: memref<1x16x32xbf16, #tpu.memory_space<vmem>>, %arg5: memref<1x1x32xf32, #tpu.memory_space<vmem>>, %arg6: memref<1x1x32xf32, #tpu.memory_space<vmem>>, %arg7: memref<1x1x8x1xf32, #tpu.memory_space<vmem>>, %arg8: memref<1x128x32xbf16, #tpu.memory_space<vmem>>, %arg9: memref<1x1x128xf32, #tpu.memory_space<vmem>>, %arg10: memref<1x32x128xbf16, #tpu.memory_space<vmem>>, %arg11: memref<1x1x32xf32, #tpu.memory_space<vmem>>, %arg12: memref<1x1x8x32xbf16, #tpu.memory_space<vmem>>, %arg13: memref<8x32xbf16, #tpu.memory_space<vmem>>, %arg14: memref<8x32xf32, #tpu.memory_space<vmem>>) attributes {dimension_semantics = [#tpu.dimension_semantics<parallel>, #tpu.dimension_semantics<parallel>, #tpu.dimension_semantics<arbitrary>], iteration_bounds = array<i64: 4, 2, 1>, scalar_prefetch = 0 : i64, scratch_operands = 2 : i64, tpu.core_type = #tpu.core_type<tc>, window_params = [{transform_indices = @transform_0, window_bounds = array<i64: 1, 1, 8, 1>}, {transform_indices = @transform_1, window_bounds = array<i64: 1, 16, 32>}, {transform_indices = @transform_2, window_bounds = array<i64: 1, 1, 32>}, {transform_indices = @transform_3, window_bounds = array<i64: 1, 1, 32>}, {transform_indices = @transform_4, window_bounds = array<i64: 1, 1, 8, 1>}, {transform_indices = @transform_5, window_bounds = array<i64: 1, 128, 32>}, {transform_indices = @transform_6, window_bounds = array<i64: 1, 1, 128>}, {transform_indices = @transform_7, window_bounds = array<i64: 1, 32, 128>}, {transform_indices = @transform_8, window_bounds = array<i64: 1, 1, 32>}, {transform_indices = @transform_9, window_bounds = array<i64: 1, 1, 8, 32>}]} {
    %c0_i32 = arith.constant 0 : i32
    %0 = arith.cmpi eq, %arg2, %c0_i32 : i32
    %1 = arith.extui %0 : i1 to i32
    %c0_i32_0 = arith.constant 0 : i32
    %2 = arith.cmpi ne, %1, %c0_i32_0 : i32
    scf.if %2 {
      %34 = tpu.iota {dimensions = array<i32: 1>} : vector<8x16xi32>
      %c0_22 = arith.constant 0 : index
      %c0_23 = arith.constant 0 : index
      %c0_24 = arith.constant 0 : index
      %c0_25 = arith.constant 0 : index
      %35 = vector.load %arg3[%c0_22, %c0_23, %c0_24, %c0_25] : memref<1x1x8x1xi32, #tpu.memory_space<vmem>>, vector<1x1x8x1xi32>
      %36 = vector.shape_cast %35 : vector<1x1x8x1xi32> to vector<8x1xi32>
      %37 = vector.broadcast %36 : vector<8x1xi32> to vector<8x16xi32>
      %38 = arith.cmpi eq, %34, %37 : vector<8x16xi32>
      %39 = arith.extui %38 : vector<8x16xi1> to vector<8x16xi32>
      %40 = arith.sitofp %39 : vector<8x16xi32> to vector<8x16xf32>
      %41 = arith.truncf %40 : vector<8x16xf32> to vector<8x16xbf16>
      %c0_26 = arith.constant 0 : index
      %c0_27 = arith.constant 0 : index
      %c0_28 = arith.constant 0 : index
      %42 = vector.load %arg4[%c0_26, %c0_27, %c0_28] : memref<1x16x32xbf16, #tpu.memory_space<vmem>>, vector<1x16x32xbf16>
      %43 = vector.shape_cast %42 : vector<1x16x32xbf16> to vector<16x32xbf16>
      %cst_29 = arith.constant dense<0.000000e+00> : vector<8x32xf32>
      %44 = tpu.matmul %41, %43, %cst_29 {dimension_numbers = #tpu.dot_dimension_numbers<[1], [0], [0], [1], [0, 0, 1, 1], [], []>} : vector<8x16xbf16>, vector<16x32xbf16>, vector<8x32xf32> -> vector<8x32xf32>
      %cst_30 = arith.constant dense<0.000000e+00> : vector<8xf32>
      %45 = vector.multi_reduction <add>, %44, %cst_30 [1] : vector<8x32xf32> to vector<8xf32>
      %46 = vector.shape_cast %45 : vector<8xf32> to vector<8x1xf32>
      %cst_31 = arith.constant 3.200000e+01 : f32
      %47 = vector.broadcast %cst_31 : f32 to vector<8x1xf32>
      %48 = arith.divf %46, %47 : vector<8x1xf32>
      %49 = vector.broadcast %48 : vector<8x1xf32> to vector<8x32xf32>
      %50 = arith.subf %44, %49 : vector<8x32xf32>
      %51 = arith.mulf %50, %50 : vector<8x32xf32>
      %cst_32 = arith.constant dense<0.000000e+00> : vector<8xf32>
      %52 = vector.multi_reduction <add>, %51, %cst_32 [1] : vector<8x32xf32> to vector<8xf32>
      %53 = vector.shape_cast %52 : vector<8xf32> to vector<8x1xf32>
      %cst_33 = arith.constant 3.200000e+01 : f32
      %54 = vector.broadcast %cst_33 : f32 to vector<8x1xf32>
      %55 = arith.divf %53, %54 : vector<8x1xf32>
      %56 = vector.broadcast %48 : vector<8x1xf32> to vector<8x32xf32>
      %57 = arith.subf %44, %56 : vector<8x32xf32>
      %cst_34 = arith.constant 9.99999997E-7 : f32
      %58 = vector.broadcast %cst_34 : f32 to vector<8x1xf32>
      %59 = arith.addf %55, %58 : vector<8x1xf32>
      %60 = math.rsqrt %59 : vector<8x1xf32>
      %61 = vector.broadcast %60 : vector<8x1xf32> to vector<8x32xf32>
      %62 = arith.mulf %57, %61 : vector<8x32xf32>
      %c0_35 = arith.constant 0 : index
      %c0_36 = arith.constant 0 : index
      %c0_37 = arith.constant 0 : index
      %63 = vector.load %arg6[%c0_35, %c0_36, %c0_37] : memref<1x1x32xf32, #tpu.memory_space<vmem>>, vector<1x1x32xf32>
      %64 = vector.shape_cast %63 : vector<1x1x32xf32> to vector<1x32xf32>
      %cst_38 = arith.constant 1.000000e+00 : f32
      %65 = vector.broadcast %cst_38 : f32 to vector<1x32xf32>
      %66 = arith.addf %65, %64 : vector<1x32xf32>
      %67 = vector.broadcast %66 : vector<1x32xf32> to vector<8x32xf32>
      %68 = arith.mulf %62, %67 : vector<8x32xf32>
      %c0_39 = arith.constant 0 : index
      %c0_40 = arith.constant 0 : index
      %c0_41 = arith.constant 0 : index
      %69 = vector.load %arg5[%c0_39, %c0_40, %c0_41] : memref<1x1x32xf32, #tpu.memory_space<vmem>>, vector<1x1x32xf32>
      %70 = vector.shape_cast %69 : vector<1x1x32xf32> to vector<1x32xf32>
      %71 = vector.broadcast %70 : vector<1x32xf32> to vector<8x32xf32>
      %72 = arith.addf %68, %71 : vector<8x32xf32>
      %73 = arith.truncf %72 : vector<8x32xf32> to vector<8x32xbf16>
      %c0_42 = arith.constant 0 : index
      %c0_43 = arith.constant 0 : index
      %74 = vector.load %arg13[%c0_42, %c0_43] : memref<8x32xbf16, #tpu.memory_space<vmem>>, vector<8x32xbf16>
      tpu.vector_store %arg13[%c0_42, %c0_43], %73 {strides = array<i32>} : memref<8x32xbf16, #tpu.memory_space<vmem>>, vector<8x32xbf16>,
      %cst_44 = arith.constant 0.000000e+00 : f32
      %75 = vector.broadcast %cst_44 : f32 to vector<8x32xf32>
      %c0_45 = arith.constant 0 : index
      %c0_46 = arith.constant 0 : index
      %76 = vector.load %arg14[%c0_45, %c0_46] : memref<8x32xf32, #tpu.memory_space<vmem>>, vector<8x32xf32>
      tpu.vector_store %arg14[%c0_45, %c0_46], %75 {strides = array<i32>} : memref<8x32xf32, #tpu.memory_space<vmem>>, vector<8x32xf32>,
    } else {
    }
    %c0 = arith.constant 0 : index
    %c0_1 = arith.constant 0 : index
    %3 = vector.load %arg13[%c0, %c0_1] : memref<8x32xbf16, #tpu.memory_space<vmem>>, vector<8x32xbf16>
    %c0_2 = arith.constant 0 : index
    %c0_3 = arith.constant 0 : index
    %c0_4 = arith.constant 0 : index
    %4 = vector.load %arg8[%c0_2, %c0_3, %c0_4] : memref<1x128x32xbf16, #tpu.memory_space<vmem>>, vector<1x128x32xbf16>
    %5 = vector.shape_cast %4 : vector<1x128x32xbf16> to vector<128x32xbf16>
    %cst = arith.constant dense<0.000000e+00> : vector<8x128xf32>
    %6 = tpu.matmul %3, %5, %cst {dimension_numbers = #tpu.dot_dimension_numbers<[1], [1], [0], [0], [0, 0, 1, 0], [], []>} : vector<8x32xbf16>, vector<128x32xbf16>, vector<8x128xf32> -> vector<8x128xf32>
    %c0_5 = arith.constant 0 : index
    %c0_6 = arith.constant 0 : index
    %c0_7 = arith.constant 0 : index
    %7 = vector.load %arg9[%c0_5, %c0_6, %c0_7] : memref<1x1x128xf32, #tpu.memory_space<vmem>>, vector<1x1x128xf32>
    %8 = vector.shape_cast %7 : vector<1x1x128xf32> to vector<1x128xf32>
    %9 = vector.broadcast %8 : vector<1x128xf32> to vector<8x128xf32>
    %10 = arith.addf %6, %9 : vector<8x128xf32>
    %cst_8 = arith.constant 5.000000e-01 : f32
    %11 = vector.broadcast %cst_8 : f32 to vector<8x128xf32>
    %12 = arith.mulf %11, %10 : vector<8x128xf32>
    %cst_9 = arith.constant 4.471500e-02 : f32
    %13 = vector.broadcast %cst_9 : f32 to vector<8x128xf32>
    %14 = arith.mulf %13, %10 : vector<8x128xf32>
    %15 = arith.mulf %14, %10 : vector<8x128xf32>
    %16 = arith.mulf %15, %10 : vector<8x128xf32>
    %17 = arith.addf %10, %16 : vector<8x128xf32>
    %cst_10 = arith.constant 0.797884583 : f32
    %18 = vector.broadcast %cst_10 : f32 to vector<8x128xf32>
    %19 = arith.mulf %18, %17 : vector<8x128xf32>
    %20 = math.tanh %19 : vector<8x128xf32>
    %cst_11 = arith.constant 1.000000e+00 : f32
    %21 = vector.broadcast %cst_11 : f32 to vector<8x128xf32>
    %22 = arith.addf %21, %20 : vector<8x128xf32>
    %23 = arith.mulf %12, %22 : vector<8x128xf32>
    %c0_12 = arith.constant 0 : index
    %c0_13 = arith.constant 0 : index
    %24 = vector.load %arg14[%c0_12, %c0_13] : memref<8x32xf32, #tpu.memory_space<vmem>>, vector<8x32xf32>
    %25 = arith.truncf %23 : vector<8x128xf32> to vector<8x128xbf16>
    %c0_14 = arith.constant 0 : index
    %c0_15 = arith.constant 0 : index
    %c0_16 = arith.constant 0 : index
    %26 = vector.load %arg10[%c0_14, %c0_15, %c0_16] : memref<1x32x128xbf16, #tpu.memory_space<vmem>>, vector<1x32x128xbf16>
    %27 = vector.shape_cast %26 : vector<1x32x128xbf16> to vector<32x128xbf16>
    %cst_17 = arith.constant dense<0.000000e+00> : vector<8x32xf32>
    %28 = tpu.matmul %25, %27, %cst_17 {dimension_numbers = #tpu.dot_dimension_numbers<[1], [1], [0], [0], [0, 0, 1, 0], [], []>} : vector<8x128xbf16>, vector<32x128xbf16>, vector<8x32xf32> -> vector<8x32xf32>
    %29 = arith.addf %24, %28 : vector<8x32xf32>
    %c0_18 = arith.constant 0 : index
    %c0_19 = arith.constant 0 : index
    %30 = vector.load %arg14[%c0_18, %c0_19] : memref<8x32xf32, #tpu.memory_space<vmem>>, vector<8x32xf32>
    tpu.vector_store %arg14[%c0_18, %c0_19], %29 {strides = array<i32>} : memref<8x32xf32, #tpu.memory_space<vmem>>, vector<8x32xf32>,
    %c0_i32_20 = arith.constant 0 : i32
    %31 = arith.cmpi eq, %arg2, %c0_i32_20 : i32
    %32 = arith.extui %31 : i1 to i32
    %c0_i32_21 = arith.constant 0 : i32
    %33 = arith.cmpi ne, %32, %c0_i32_21 : i32
    scf.if %33 {
      %c0_22 = arith.constant 0 : index
      %c0_23 = arith.constant 0 : index
      %34 = vector.load %arg14[%c0_22, %c0_23] : memref<8x32xf32, #tpu.memory_space<vmem>>, vector<8x32xf32>
      %c0_24 = arith.constant 0 : index
      %c0_25 = arith.constant 0 : index
      %c0_26 = arith.constant 0 : index
      %35 = vector.load %arg11[%c0_24, %c0_25, %c0_26] : memref<1x1x32xf32, #tpu.memory_space<vmem>>, vector<1x1x32xf32>
      %36 = vector.shape_cast %35 : vector<1x1x32xf32> to vector<1x32xf32>
      %37 = vector.broadcast %36 : vector<1x32xf32> to vector<8x32xf32>
      %38 = arith.addf %34, %37 : vector<8x32xf32>
      %c0_27 = arith.constant 0 : index
      %c0_28 = arith.constant 0 : index
      %c0_29 = arith.constant 0 : index
      %c0_30 = arith.constant 0 : index
      %39 = vector.load %arg7[%c0_27, %c0_28, %c0_29, %c0_30] : memref<1x1x8x1xf32, #tpu.memory_space<vmem>>, vector<1x1x8x1xf32>
      %40 = vector.shape_cast %39 : vector<1x1x8x1xf32> to vector<8x1xf32>
      %41 = vector.broadcast %40 : vector<8x1xf32> to vector<8x32xf32>
      %42 = arith.mulf %38, %41 : vector<8x32xf32>
      %43 = arith.truncf %42 : vector<8x32xf32> to vector<8x32xbf16>
      %c0_31 = arith.constant 0 : index
      %c0_32 = arith.constant 0 : index
      %c0_33 = arith.constant 0 : index
      %c0_34 = arith.constant 0 : index
      %44 = vector.load %arg12[%c0_31, %c0_32, %c0_33, %c0_34] : memref<1x1x8x32xbf16, #tpu.memory_space<vmem>>, vector<1x1x8x32xbf16>
      %45 = vector.shape_cast %44 : vector<1x1x8x32xbf16> to vector<8x32xbf16>
      %46 = vector.shape_cast %43 : vector<8x32xbf16> to vector<1x1x8x32xbf16>
      tpu.vector_store %arg12[%c0_31, %c0_32, %c0_33, %c0_34], %46 {strides = array<i32>} : memref<1x1x8x32xbf16, #tpu.memory_space<vmem>>, vector<1x1x8x32xbf16>,
    } else {
    }
    return
  }
  func.func @transform_0(%arg0: i32, %arg1: i32, %arg2: i32) -> (i32, i32, i32, i32) {
    %c0_i32 = arith.constant 0 : i32
    %c0_i32_0 = arith.constant 0 : i32
    %c0_i32_1 = arith.constant 0 : i32
    return %arg1, %arg0, %c0_i32, %c0_i32_0 : i32, i32, i32, i32
  }
  func.func @transform_1(%arg0: i32, %arg1: i32, %arg2: i32) -> (i32, i32, i32) {
    %c0_i32 = arith.constant 0 : i32
    %c0_i32_0 = arith.constant 0 : i32
    %c0_i32_1 = arith.constant 0 : i32
    return %arg1, %c0_i32, %c0_i32_0 : i32, i32, i32
  }
  func.func @transform_2(%arg0: i32, %arg1: i32, %arg2: i32) -> (i32, i32, i32) {
    %c0_i32 = arith.constant 0 : i32
    %c0_i32_0 = arith.constant 0 : i32
    %c0_i32_1 = arith.constant 0 : i32
    return %arg1, %c0_i32, %c0_i32_0 : i32, i32, i32
  }
  func.func @transform_3(%arg0: i32, %arg1: i32, %arg2: i32) -> (i32, i32, i32) {
    %c0_i32 = arith.constant 0 : i32
    %c0_i32_0 = arith.constant 0 : i32
    %c0_i32_1 = arith.constant 0 : i32
    return %arg1, %c0_i32, %c0_i32_0 : i32, i32, i32
  }
  func.func @transform_4(%arg0: i32, %arg1: i32, %arg2: i32) -> (i32, i32, i32, i32) {
    %c0_i32 = arith.constant 0 : i32
    %c0_i32_0 = arith.constant 0 : i32
    %c0_i32_1 = arith.constant 0 : i32
    return %arg1, %arg0, %c0_i32, %c0_i32_0 : i32, i32, i32, i32
  }
  func.func @transform_5(%arg0: i32, %arg1: i32, %arg2: i32) -> (i32, i32, i32) {
    %c0_i32 = arith.constant 0 : i32
    %c0_i32_0 = arith.constant 0 : i32
    return %arg0, %arg2, %c0_i32 : i32, i32, i32
  }
  func.func @transform_6(%arg0: i32, %arg1: i32, %arg2: i32) -> (i32, i32, i32) {
    %c0_i32 = arith.constant 0 : i32
    %c0_i32_0 = arith.constant 0 : i32
    return %arg0, %c0_i32, %arg2 : i32, i32, i32
  }
  func.func @transform_7(%arg0: i32, %arg1: i32, %arg2: i32) -> (i32, i32, i32) {
    %c0_i32 = arith.constant 0 : i32
    %c0_i32_0 = arith.constant 0 : i32
    return %arg0, %c0_i32, %arg2 : i32, i32, i32
  }
  func.func @transform_8(%arg0: i32, %arg1: i32, %arg2: i32) -> (i32, i32, i32) {
    %c0_i32 = arith.constant 0 : i32
    %c0_i32_0 = arith.constant 0 : i32
    %c0_i32_1 = arith.constant 0 : i32
    return %arg0, %c0_i32, %c0_i32_0 : i32, i32, i32
  }
  func.func @transform_9(%arg0: i32, %arg1: i32, %arg2: i32) -> (i32, i32, i32, i32) {
    %c0_i32 = arith.constant 0 : i32
    %c0_i32_0 = arith.constant 0 : i32
    %c0_i32_1 = arith.constant 0 : i32
    return %arg1, %arg0, %c0_i32, %c0_i32_0 : i32, i32, i32, i32
  }
}

module attributes {stable_mosaic.version = 11 : i64} {
  func.func @moe_combine_kernel(%arg0: i32, %arg1: i32, %arg2: memref<1x4x8xi32, #tpu.memory_space<vmem>>, %arg3: memref<1x4x8x32xbf16, #tpu.memory_space<vmem>>, %arg4: memref<1x16x32xf32, #tpu.memory_space<vmem>>, %arg5: memref<1x1x32xf32, #tpu.memory_space<vmem>>, %arg6: memref<1x16x32xf32, #tpu.memory_space<vmem>>) attributes {dimension_semantics = [#tpu.dimension_semantics<parallel>, #tpu.dimension_semantics<parallel>], iteration_bounds = array<i64: 2, 1>, scalar_prefetch = 0 : i64, scratch_operands = 0 : i64, tpu.core_type = #tpu.core_type<tc>, window_params = [{transform_indices = @transform_0, window_bounds = array<i64: 1, 4, 8>}, {transform_indices = @transform_1, window_bounds = array<i64: 1, 4, 8, 32>}, {transform_indices = @transform_2, window_bounds = array<i64: 1, 16, 32>}, {transform_indices = @transform_3, window_bounds = array<i64: 1, 1, 32>}, {transform_indices = @transform_4, window_bounds = array<i64: 1, 16, 32>}]} {
    %c16_i32 = arith.constant 16 : i32
    %0 = arith.muli %arg1, %c16_i32 : i32
    %1 = tpu.iota {dimensions = array<i32: 0>} : vector<16x8xi32>
    %2 = vector.broadcast %0 : i32 to vector<16x8xi32>
    %3 = arith.addi %2, %1 : vector<16x8xi32>
    %cst = arith.constant 0.000000e+00 : f32
    %4 = vector.broadcast %cst : f32 to vector<16x32xf32>
    %c0 = arith.constant 0 : index
    %c0_0 = arith.constant 0 : index
    %c0_1 = arith.constant 0 : index
    %5 = vector.load %arg2[%c0, %c0_0, %c0_1] : memref<1x4x8xi32, #tpu.memory_space<vmem>>, vector<1x1x8xi32>
    %6 = vector.shape_cast %5 : vector<1x1x8xi32> to vector<1x8xi32>
    %7 = vector.broadcast %6 : vector<1x8xi32> to vector<16x8xi32>
    %8 = arith.cmpi eq, %3, %7 : vector<16x8xi32>
    %9 = arith.extui %8 : vector<16x8xi1> to vector<16x8xi32>
    %10 = arith.sitofp %9 : vector<16x8xi32> to vector<16x8xf32>
    %11 = arith.truncf %10 : vector<16x8xf32> to vector<16x8xbf16>
    %c0_2 = arith.constant 0 : index
    %c0_3 = arith.constant 0 : index
    %c0_4 = arith.constant 0 : index
    %c0_5 = arith.constant 0 : index
    %12 = vector.load %arg3[%c0_2, %c0_3, %c0_4, %c0_5] : memref<1x4x8x32xbf16, #tpu.memory_space<vmem>>, vector<1x1x8x32xbf16>
    %13 = vector.shape_cast %12 : vector<1x1x8x32xbf16> to vector<8x32xbf16>
    %cst_6 = arith.constant dense<0.000000e+00> : vector<16x32xf32>
    %14 = tpu.matmul %11, %13, %cst_6 {dimension_numbers = #tpu.dot_dimension_numbers<[1], [0], [0], [1], [0, 0, 1, 1], [], []>} : vector<16x8xbf16>, vector<8x32xbf16>, vector<16x32xf32> -> vector<16x32xf32>
    %15 = arith.addf %4, %14 : vector<16x32xf32>
    %c0_7 = arith.constant 0 : index
    %c1 = arith.constant 1 : index
    %c0_8 = arith.constant 0 : index
    %16 = vector.load %arg2[%c0_7, %c1, %c0_8] : memref<1x4x8xi32, #tpu.memory_space<vmem>>, vector<1x1x8xi32>
    %17 = vector.shape_cast %16 : vector<1x1x8xi32> to vector<1x8xi32>
    %18 = vector.broadcast %17 : vector<1x8xi32> to vector<16x8xi32>
    %19 = arith.cmpi eq, %3, %18 : vector<16x8xi32>
    %20 = arith.extui %19 : vector<16x8xi1> to vector<16x8xi32>
    %21 = arith.sitofp %20 : vector<16x8xi32> to vector<16x8xf32>
    %22 = arith.truncf %21 : vector<16x8xf32> to vector<16x8xbf16>
    %c0_9 = arith.constant 0 : index
    %c1_10 = arith.constant 1 : index
    %c0_11 = arith.constant 0 : index
    %c0_12 = arith.constant 0 : index
    %23 = vector.load %arg3[%c0_9, %c1_10, %c0_11, %c0_12] : memref<1x4x8x32xbf16, #tpu.memory_space<vmem>>, vector<1x1x8x32xbf16>
    %24 = vector.shape_cast %23 : vector<1x1x8x32xbf16> to vector<8x32xbf16>
    %cst_13 = arith.constant dense<0.000000e+00> : vector<16x32xf32>
    %25 = tpu.matmul %22, %24, %cst_13 {dimension_numbers = #tpu.dot_dimension_numbers<[1], [0], [0], [1], [0, 0, 1, 1], [], []>} : vector<16x8xbf16>, vector<8x32xbf16>, vector<16x32xf32> -> vector<16x32xf32>
    %26 = arith.addf %15, %25 : vector<16x32xf32>
    %c0_14 = arith.constant 0 : index
    %c2 = arith.constant 2 : index
    %c0_15 = arith.constant 0 : index
    %27 = vector.load %arg2[%c0_14, %c2, %c0_15] : memref<1x4x8xi32, #tpu.memory_space<vmem>>, vector<1x1x8xi32>
    %28 = vector.shape_cast %27 : vector<1x1x8xi32> to vector<1x8xi32>
    %29 = vector.broadcast %28 : vector<1x8xi32> to vector<16x8xi32>
    %30 = arith.cmpi eq, %3, %29 : vector<16x8xi32>
    %31 = arith.extui %30 : vector<16x8xi1> to vector<16x8xi32>
    %32 = arith.sitofp %31 : vector<16x8xi32> to vector<16x8xf32>
    %33 = arith.truncf %32 : vector<16x8xf32> to vector<16x8xbf16>
    %c0_16 = arith.constant 0 : index
    %c2_17 = arith.constant 2 : index
    %c0_18 = arith.constant 0 : index
    %c0_19 = arith.constant 0 : index
    %34 = vector.load %arg3[%c0_16, %c2_17, %c0_18, %c0_19] : memref<1x4x8x32xbf16, #tpu.memory_space<vmem>>, vector<1x1x8x32xbf16>
    %35 = vector.shape_cast %34 : vector<1x1x8x32xbf16> to vector<8x32xbf16>
    %cst_20 = arith.constant dense<0.000000e+00> : vector<16x32xf32>
    %36 = tpu.matmul %33, %35, %cst_20 {dimension_numbers = #tpu.dot_dimension_numbers<[1], [0], [0], [1], [0, 0, 1, 1], [], []>} : vector<16x8xbf16>, vector<8x32xbf16>, vector<16x32xf32> -> vector<16x32xf32>
    %37 = arith.addf %26, %36 : vector<16x32xf32>
    %c0_21 = arith.constant 0 : index
    %c3 = arith.constant 3 : index
    %c0_22 = arith.constant 0 : index
    %38 = vector.load %arg2[%c0_21, %c3, %c0_22] : memref<1x4x8xi32, #tpu.memory_space<vmem>>, vector<1x1x8xi32>
    %39 = vector.shape_cast %38 : vector<1x1x8xi32> to vector<1x8xi32>
    %40 = vector.broadcast %39 : vector<1x8xi32> to vector<16x8xi32>
    %41 = arith.cmpi eq, %3, %40 : vector<16x8xi32>
    %42 = arith.extui %41 : vector<16x8xi1> to vector<16x8xi32>
    %43 = arith.sitofp %42 : vector<16x8xi32> to vector<16x8xf32>
    %44 = arith.truncf %43 : vector<16x8xf32> to vector<16x8xbf16>
    %c0_23 = arith.constant 0 : index
    %c3_24 = arith.constant 3 : index
    %c0_25 = arith.constant 0 : index
    %c0_26 = arith.constant 0 : index
    %45 = vector.load %arg3[%c0_23, %c3_24, %c0_25, %c0_26] : memref<1x4x8x32xbf16, #tpu.memory_space<vmem>>, vector<1x1x8x32xbf16>
    %46 = vector.shape_cast %45 : vector<1x1x8x32xbf16> to vector<8x32xbf16>
    %cst_27 = arith.constant dense<0.000000e+00> : vector<16x32xf32>
    %47 = tpu.matmul %44, %46, %cst_27 {dimension_numbers = #tpu.dot_dimension_numbers<[1], [0], [0], [1], [0, 0, 1, 1], [], []>} : vector<16x8xbf16>, vector<8x32xbf16>, vector<16x32xf32> -> vector<16x32xf32>
    %48 = arith.addf %37, %47 : vector<16x32xf32>
    %c0_28 = arith.constant 0 : index
    %c0_29 = arith.constant 0 : index
    %c0_30 = arith.constant 0 : index
    %49 = vector.load %arg4[%c0_28, %c0_29, %c0_30] : memref<1x16x32xf32, #tpu.memory_space<vmem>>, vector<1x16x32xf32>
    %50 = vector.shape_cast %49 : vector<1x16x32xf32> to vector<16x32xf32>
    %c0_31 = arith.constant 0 : index
    %c0_32 = arith.constant 0 : index
    %c0_33 = arith.constant 0 : index
    %51 = vector.load %arg5[%c0_31, %c0_32, %c0_33] : memref<1x1x32xf32, #tpu.memory_space<vmem>>, vector<1x1x32xf32>
    %52 = vector.shape_cast %51 : vector<1x1x32xf32> to vector<1x32xf32>
    %53 = vector.broadcast %52 : vector<1x32xf32> to vector<16x32xf32>
    %54 = arith.mulf %53, %48 : vector<16x32xf32>
    %55 = arith.addf %50, %54 : vector<16x32xf32>
    %c0_34 = arith.constant 0 : index
    %c0_35 = arith.constant 0 : index
    %c0_36 = arith.constant 0 : index
    %56 = vector.load %arg6[%c0_34, %c0_35, %c0_36] : memref<1x16x32xf32, #tpu.memory_space<vmem>>, vector<1x16x32xf32>
    %57 = vector.shape_cast %56 : vector<1x16x32xf32> to vector<16x32xf32>
    %58 = vector.shape_cast %55 : vector<16x32xf32> to vector<1x16x32xf32>
    tpu.vector_store %arg6[%c0_34, %c0_35, %c0_36], %58 {strides = array<i32>} : memref<1x16x32xf32, #tpu.memory_space<vmem>>, vector<1x16x32xf32>,
    return
  }
  func.func @transform_0(%arg0: i32, %arg1: i32) -> (i32, i32, i32) {
    %c0_i32 = arith.constant 0 : i32
    %c0_i32_0 = arith.constant 0 : i32
    %c0_i32_1 = arith.constant 0 : i32
    return %arg0, %c0_i32, %c0_i32_0 : i32, i32, i32
  }
  func.func @transform_1(%arg0: i32, %arg1: i32) -> (i32, i32, i32, i32) {
    %c0_i32 = arith.constant 0 : i32
    %c0_i32_0 = arith.constant 0 : i32
    %c0_i32_1 = arith.constant 0 : i32
    %c0_i32_2 = arith.constant 0 : i32
    return %arg0, %c0_i32, %c0_i32_0, %c0_i32_1 : i32, i32, i32, i32
  }
  func.func @transform_2(%arg0: i32, %arg1: i32) -> (i32, i32, i32) {
    %c0_i32 = arith.constant 0 : i32
    %c0_i32_0 = arith.constant 0 : i32
    return %arg0, %arg1, %c0_i32 : i32, i32, i32
  }
  func.func @transform_3(%arg0: i32, %arg1: i32) -> (i32, i32, i32) {
    %c0_i32 = arith.constant 0 : i32
    %c0_i32_0 = arith.constant 0 : i32
    %c0_i32_1 = arith.constant 0 : i32
    return %arg0, %c0_i32, %c0_i32_0 : i32, i32, i32
  }
  func.func @transform_4(%arg0: i32, %arg1: i32) -> (i32, i32, i32) {
    %c0_i32 = arith.constant 0 : i32
    %c0_i32_0 = arith.constant 0 : i32
    return %arg0, %arg1, %c0_i32 : i32, i32, i32
  }
}

</mosaic_0001>

<bundles_post_ra>
// kernel: dit_block_forward.4
= control target key start
LH: loop header
LB: loop body
LE: loop exit
PB: predicated region body
PF: predicated region fallthrough
CT: control target
= control target key end

     0   :  { %8 = vsyncpa [#allocation3], 0  ;;  %s835_s0 = inlined_call_operand.hbm [shape: f32[2,32], index: 0, kind: input, shape index: {}]   ;;  %s836_s1 = inlined_call_operand.hbm [shape: bf16[6,32,32], index: 1, kind: input, shape index: {}]   ;;  %s837_s2 = inlined_call_operand.hbm [shape: f32[6,1,32], index: 2, kind: input, shape index: {}]   ;;  %s838_s3 = inlined_call_operand.vmem [shape: f32[6,2,32], index: 3, kind: output, shape index: {}]  }
   0x1   :  { %9 = vsyncpa [#allocation5], 0 }
   0x2   :  { %11 = vsyncpa [#allocation5 + $0x1], 0  ;;  %s655_s12 = smov 0   ;;  %s657_s13 = smov 0  }
   0x3   :  { %s659_s14 = smov 0   ;;  %s661_s15 = smov 0  }
   0x4 LB: > { %s676_s16 = sadd.s32 1, %s626_s15   ;;  %s45_s17 = sadd.s32 1, %s622_s14  ;;  %s626_s15 = sphi %s661_s15, %s855_s15   ;;  %s622_s14 = sphi %s659_s14, %s854_s14   ;;  %s618_s13 = sphi %s657_s13, %s853_s13   ;;  %s614_s12 = sphi %s655_s12, %s852_s12  }
   0x5   : > { %s42_s18 = ssub.s32 %s626_s15, %s676_s16  ;;  %p52_p0 = scmp.ne.s32.totalorder %s622_s14, %s618_s13 }
   0x6   : > { %p43_p1 = scmp.eq.s32.totalorder %s42_s18, 0  ;;  %p53_p2 = scmp.eq.s32.totalorder %s626_s15, 0 }
   0x7   : > { %p461_p3 = scmp.lt.s32.totalorder %s626_s15, 6  ;;  %s145_s20 = sand.u32 1, %s626_s15  }
   0x8   : > { %s686_s19 = scalar_select %p43_p1, %s622_s14, %s45_s17  }
   0x9   : > { %p54_p4 = por %p53_p2, %p52_p0  ;;  %s147_s21 = sand.u32 1, %s622_s14  }
   0xa   : > { %s414_s22 = sshll.u32 %s147_s21, 4  ;;  %s429_s23 = sshll.u32 %s626_s15, 8 }
   0xb   : > { %s696_s26 = scalar_lea.hbm %s836_s1, %s429_s23  ;;  %s149_s27 = scalar_lea.vmem [#allocation4], %s414_s22 }
   0xc   : > { %s156_s28 = sshll.u32 %s149_s27, 4  ;;  %p698_p5 = pnand %p461_p3, %p54_p4  ;;  %s702_s28 = int_to_ptr.vmem [resolvable:$true] %s156_s28 }
   0xd   : > { %s704_s30 = scalar_lea.sflag [#allocation5], %s145_s20  ;;  %s506_s4 = scalar_lea.hbm %s696_s26, 256 }
   0xe   : > { %p507_p6 = scmp.ne.s32.totalorder %s696_s26, %s506_s4  ;;  %p508_p7 = pneg %p698_p5 }
   0xf   : > { %s511_s7 = scalar_lea.hbm %s836_s1, 1536  ;;  %p512_p10 = scmp.lt.s32.totalorder %s696_s26, %s836_s1 }
  0x10   : > { %p509_p8 = pnand %p508_p7, %p507_p6  ;;  %p513_p11 = scmp.lt.s32.totalorder %s511_s7, %s506_s4 }
  0x12   : > { %p510_p9 = pneg %p509_p8  ;;  %p514_p12 = por %p513_p11, %p512_p10 }
  0x14   : > { %p515_p13 = pnand %p514_p12, %p510_p9 }
  0x16   : > { %518 = shalt.err (!%p515_p13)
}
  0x17   : > { %s519_s10 = scalar_lea.vmem %s702_s28, 256  ;;  %s628_s11 = smov [#allocation4]  }
  0x18   : > { %p520_p0 = scmp.ne.s32.totalorder %s702_s28, %s519_s10  ;;  %s524_s17 = sshll.u32 %s628_s11, 4  ;;  %s525_s17 = int_to_ptr.vmem [resolvable:$false] %s524_s17 }
  0x19   : > { %s526_s18 = scalar_lea.vmem %s525_s17, 512  ;;  %p527_p3 = scmp.lt.s32.totalorder %s702_s28, %s525_s17 }
  0x1a   : > { %p522_p1 = pnand %p520_p0, %p508_p7  ;;  %p528_p4 = scmp.lt.s32.totalorder %s526_s18, %s519_s10 }
  0x1c   : > { %p523_p2 = pneg %p522_p1  ;;  %p529_p6 = por %p528_p4, %p527_p3 }
  0x1e   : > { %p530_p8 = pnand %p529_p6, %p523_p2 }
  0x20   : > { %533 = shalt.err (!%p530_p8)
}
  0x21   : > { %s629_s20 = smov 64   ;;  %s630_s22 = smov 4  }
  0x22   : > { %456 = dma.hbm_to_vmem [thread:$0]  (!%p698_p5), %s696_s26, 256, %s702_s28, %s704_s30, %s629_s20, %s629_s20, %s630_s22  }
  0x23   : > { %s732_s23 = sadd.s32 4294967295, %s626_s15   ;;  %p58_p10 = scmp.ne.s32.totalorder %s618_s13, %s614_s12 }
  0x24   : > { %p839_p9 = scmp.eq.s32.totalorder %s732_s23, 0  ;;  %p411_p11 = scmp.ge.s32.totalorder %s626_s15, 1 }
  0x25   : > { %p121_p12 = scmp.lt.s32.totalorder %s626_s15, 7  ;;  %s631_s26 = smov [#allocation2]  }
  0x26   : > { %p741_p13 = por %p839_p9, %p58_p10  ;;  %s134_s27 = sshll.u32 %s631_s26, 4  ;;  %s749_s27 = int_to_ptr.vmem [resolvable:$true] %s134_s27 }
  0x27   : > { %p745_p0 = pnand %p411_p11, %p121_p12  ;;  %s417_s12 = sshll.u32 %s626_s15, 4 }
  0x28   : > { %s844_s24 = scalar_select %p741_p13, 1, 0 }
  0x29   : > { %s845_s25 = scalar_select %p745_p0, 1, 0 }
  0x2a   : > { %p449_p1 = pneg %p745_p0  ;;  %s757_s5 = scalar_lea.hbm %s837_s2, %s417_s12 }
  0x2b   : > { %s169_s6 = scalar_lea.vmem [#allocation6], %s147_s21  ;;  %s534_s9 = scalar_lea.hbm %s757_s5, 16 }
  0x2c   : > { %s176_s7 = sshll.u32 %s169_s6, 4  ;;  %p763_p2 = pnand %p449_p1, %p839_p9  ;;  %s177_s7 = int_to_ptr.vmem [resolvable:$true] %s176_s7 }
  0x2d   : > { %p535_p3 = scmp.ne.s32.totalorder %s757_s5, %s534_s9  ;;  %s539_s11 = scalar_lea.hbm %s837_s2, 96 }
  0x2e   : > { %s846_s8 = scalar_select %p763_p2, 1, 0 }
  0x2f   : > { %p537_p4 = pnand %p535_p3, %p508_p7  ;;  %p540_p8 = scmp.lt.s32.totalorder %s757_s5, %s837_s2 }
  0x30   : > { %p541_p10 = scmp.lt.s32.totalorder %s539_s11, %s534_s9 }
  0x31   : > { %p538_p6 = pneg %p537_p4 }
  0x32   : > { %p542_p11 = por %p541_p10, %p540_p8 }
  0x34   : > { %p543_p12 = pnand %p542_p11, %p538_p6 }
  0x36   : > { %546 = shalt.err (!%p543_p12)
}
  0x37   : > { %s547_s21 = scalar_lea.vmem %s177_s7, 16  ;;  %s632_s20 = smov [#allocation6]  }
  0x38   : > { %p548_p1 = scmp.ne.s32.totalorder %s177_s7, %s547_s21  ;;  %s552_s22 = sshll.u32 %s632_s20, 4  ;;  %s553_s22 = int_to_ptr.vmem [resolvable:$false] %s552_s22 }
  0x39   : > { %s554_s26 = scalar_lea.vmem %s553_s22, 32  ;;  %p555_p4 = scmp.lt.s32.totalorder %s177_s7, %s553_s22 }
  0x3a   : > { %p550_p9 = pnand %p548_p1, %p508_p7  ;;  %p556_p13 = scmp.lt.s32.totalorder %s554_s26, %s547_s21 }
  0x3c   : > { %p551_p3 = pneg %p550_p9  ;;  %p557_p0 = por %p556_p13, %p555_p4 }
  0x3e   : > { %p558_p2 = pnand %p557_p0, %p551_p3 }
  0x40   : > { %561 = shalt.err (!%p558_p2)
}
  0x41   : > { %459 = dma.hbm_to_vmem [thread:$0]  (!%p698_p5), %s757_s5, 16, %s177_s7, %s704_s30  }
  0x42   : > { %p847_p7 = scmp.ne.s32.totalorder %s846_s8, 0  ;;  %s573_s12 = scalar_lea.vmem %s749_s27, 32 }
  0x43   : > { %p574_p6 = scmp.ne.s32.totalorder %s749_s27, %s573_s12  ;;  %p581_p11 = scmp.lt.s32.totalorder %s749_s27, %s749_s27 }
  0x44   : > { %p564_p9 = pneg %p847_p7  ;;  %p582_p13 = scmp.lt.s32.totalorder %s573_s12, %s573_s12 }
  0x46   : > { %p576_p8 = pnand %p574_p6, %p564_p9  ;;  %p583_p0 = por %p582_p13, %p581_p11 }
  0x48   : > { %p577_p10 = pneg %p576_p8 }
  0x4a   : > { %p584_p2 = pnand %p583_p0, %p577_p10 }
  0x4c   : > { %587 = shalt.err (!%p584_p2)
}
  0x4d   : > { %452 = dma.hbm_to_vmem [thread:$0]  (!%p847_p7), %s835_s0, 32, %s749_s27, [#allocation3]  }
  0x4e   : > { %p848_p5 = scmp.ne.s32.totalorder %s845_s25, 0 }
  0x4f   : > { %p849_p12 = scmp.eq.s32.totalorder (!%p848_p5), %s732_s23, 0 }
  0x50   : > { %185 = sbr.rel (%p848_p5) target bundleno = 328 (0x148), region = 32 }
  0x55   : > { %605 = dma.done.wait (%p849_p12), [#allocation3], 32   ;;  %p850_p1 = pmov %p849_p12 }
  0x56   : > { %s191_s30 = sand.u32 1, %s732_s23   ;;  %s193_s4 = sand.u32 1, %s618_s13  }
  0x57   : > { %607 = vsyncadd (%p850_p1), [#allocation3], 4294967264  ;;  %s420_s5 = sshll.u32 %s193_s4, 4  ;;  %s192_s6 = scalar_lea.sflag [#allocation5], %s191_s30 }
  0x58   : > { %s195_s7 = scalar_lea.vmem [#allocation4], %s420_s5  ;;  %p851_p3 = scmp.ne.s32.totalorder %s844_s24, 0 }
  0x5a   : > { %609 = dma.done.wait (%p851_p3), %s192_s6, 272  }
  0x5b   : > { %611 = vsyncadd (%p851_p3), %s192_s6, 4294967024  ;;  %v633_v0 = vmov 0.0   ;;  %vm634_vm0 = vmmov 0   ;;  %vm264_vm1 = vcmask 261120   ;;  %v500_v1 = vld [vmem:[%s195_s7 + $0x8] sm:$0xff]   ;;  %v501_v5 = vld [vmem:[%s195_s7] sm:$0xff]  }
  0x5c   : > { %433 = vmatprep.subr.bf16.mxu0 %v633_v0  ;;  %437 = vmatprep.mubr.msk.bf16.mxu0 %vm634_vm0, %v633_v0  ;;  %v272_v2 = vsel %vm264_vm1, %v500_v1, 0  ;;  %v234_v3 = vld [vmem:[#allocation2] sm:$0x3]  ;;  %v269_v6 = vsel %vm264_vm1, %v501_v5, 0  ;;  %p229_p4 = scmp.lt.s32.totalorder %s732_s23, 5  ;;  %s203_s25 = scalar_lea.vmem [#allocation6], %s193_s4 }
  0x5d   : > { %434 = vmatpush3.bf16.xpose.msra.mxu0 %v272_v2  ;;  %v422_v4 = vmul.f32 -1.442695, %v234_v3  ;;  %v423_v12 = vld [vmem:[%s203_s25] ss:$0 sm:$0xff]  ;;  %vm314_vm2 = vcmask 254976  }
  0x5e   : > { %435 = vmatprep.subr.bf16.mxu0 %v633_v0  ;;  %s857_s23 = smov (!%p229_p4, %s732_s23), 5 }
  0x5f   : > { %502 = vpow2.f32 %v422_v4  ;;  %s421_s24 = sshll.u32 %s857_s23, 1 }
  0x60   : > { %s232_s9 = scalar_lea.vmem %s838_s3, %s421_s24 }
  0x65   : > { %436 = vmatpush3.bf16.xpose.msra.mxu0 %v269_v6 }
  0x6c   : > { %v503_v7 = vpop.eup %502 }
  0x6d   : > { %v238_v8 = vadd.f32 1.0, %v503_v7 }
  0x6f   : > { %504 = vrcp.f32 %v238_v8 }
  0x7c   : > { %v505_v9 = vpop.eup %504 }
  0x7d   : > { %v241_v10 = vmul.f32 %v505_v9, %v234_v3 }
  0x7f   : > { %v242_v11 = vpack.c.bf16 %v241_v10, %v241_v10 }
  0x81   : > { %438 = vmatmul.mubr.msk.bf16.vlgmr.msra.gmra.mxu0 %vm264_vm1, %v242_v11 }
 0x141   : > { %v308_v13 = vpop.f32.mrf.mxu0 }
 0x142   : > { %v309_v14 = vadd.f32 %v423_v12, %v308_v13 }
 0x143   : > { %v439_v15 = vpop.f32.mrf.mxu0 }
 0x144   : > { %315 = vst.msk [vmem:[%s232_s9] sm:$0x3] %vm314_vm2, %v309_v14 }
 0x145   : > { %v311_v16 = vpop.f32.mrf.mxu0 }
 0x147   : > { %v440_v17 = vpop.f32.mrf.mxu0 }
 0x148 PF: > { %p14_p7 = scmp.ge.s32.totalorder %s676_s16, 8   ;;  %s852_s12 = smov %s618_s13 }
 0x149   : > { %s853_s13 = smov %s622_s14  ;;  %s854_s14 = smov %s686_s19 }
 0x14a   : > { %s855_s15 = smov %s676_s16  ;;  %16 = sbr.rel (!%p14_p7) target bundleno = 4 (0x4), region = 88 }
 0x14f   :  { %335 = vsyncpa [#allocation3], 1 }
 0x150   :  { %337 = vsyncpa [#allocation3 + $0x1], 1 }
 0x151   :  { %338 = vsyncpa [#allocation5], 1 }
 0x152   :  { %340 = vsyncpa [#allocation5 + $0x1], 1 }

// kernel: dit_block_forward.6
= control target key start
LH: loop header
LB: loop body
LE: loop exit
PB: predicated region body
PF: predicated region fallthrough
CT: control target
= control target key end

     0   :  { %s1316_s30 = smov 0   ;;  %s1318_s10 = smov 0   ;;  %s1459_s0 = inlined_call_operand.vmem [shape: s32[2,4,8,1], index: 0, kind: input, shape index: {}]   ;;  %s1460_s1 = inlined_call_operand.vmem [shape: bf16[2,16,32], index: 1, kind: input, shape index: {}]   ;;  %s1461_s2 = inlined_call_operand.vmem [shape: f32[2,1,32], index: 2, kind: input, shape index: {}]   ;;  %s1462_s3 = inlined_call_operand.vmem [shape: f32[2,1,32], index: 3, kind: input, shape index: {}]   ;;  %s1463_s4 = inlined_call_operand.vmem [shape: f32[2,4,8,1], index: 4, kind: input, shape index: {}]   ;;  %s1464_s5 = inlined_call_operand.vmem [shape: bf16[4,128,32], index: 5, kind: input, shape index: {}]   ;;  %s1465_s6 = inlined_call_operand.vmem [shape: f32[4,1,128], index: 6, kind: input, shape index: {}]   ;;  %s1466_s7 = inlined_call_operand.vmem [shape: bf16[4,32,128], index: 7, kind: input, shape index: {}]   ;;  %s1467_s8 = inlined_call_operand.vmem [shape: f32[4,1,32], index: 8, kind: input, shape index: {}]   ;;  %s1468_s9 = inlined_call_operand.vmem [shape: bf16[2,4,8,32], index: 9, kind: output, shape index: {}]  }
   0x1   :  { %s1320_s11 = smov 0   ;;  %s1322_s12 = smov 0  }
   0x2   :  { %s1324_s13 = smov 0  }
   0x3 LB: > { %s34_s14 = sadd.s32 1, %s1253_s11  ;;  %s38_s15 = sadd.s32 1, %s1257_s12  ;;  %s1261_s13 = sphi %s1324_s13, %s19_s13   ;;  %s1257_s12 = sphi %s1322_s12, %s1472_s12   ;;  %s1253_s11 = sphi %s1320_s11, %s1471_s11   ;;  %s1249_s10 = sphi %s1318_s10, %s1470_s10   ;;  %s1245_s30 = sphi %s1316_s30, %s1469_s30  }
   0x4   : > { %p36_p0 = scmp.ge.s32.totalorder %s34_s14, 2  ;;  %p1080_p1 = scmp.ge.s32.totalorder %s1261_s13, 1 }
   0x5   : > { %p407_p2 = scmp.lt.s32.totalorder %s1261_s13, 9 }
   0x6   : > { %s1474_s14 = smov (%p36_p0, %s34_s14), 0  ;;  %s1476_s15 = smov (!%p36_p0, %s38_s15), %s1257_s12 }
   0x7   : > { %p408_p3 = pnand %p1080_p1, %p407_p2  ;;  %p40_p4 = scmp.ge.s32.totalorder %s1476_s15, 4 }
   0x8   : > { %p494_p5 = scmp.lt.s32.totalorder (!%p408_p3), %s1245_s30, 1  ;;  %p496_p6 = scmp.lt.s32.totalorder (!%p408_p3), %s1249_s10, 3 }
   0x9   : > { %s1478_s15 = smov (%p40_p4, %s1476_s15), 0  ;;  %411 = sbr.rel (%p408_p3) target bundleno = 1094 (0x446), region = 56 }
   0xe   : > { %v1263_v0 = vmov 0   ;;  %v1264_v1 = vmov 0.0   ;;  %s1480_s30 = smov (!%p494_p5, %s1245_s30), 1  ;;  %v561_v2 = vlaneseq  ;;  %s1482_s10 = smov (!%p496_p6, %s1249_s10), 3  ;;  %vm1265_vm0 = vmmov 0  }
   0xf   : > { %1206 = vset.pattern.permute.xlu0 %v1263_v0  ;;  %1129 = vmatprep.subr.bf16.mxu0 %v1264_v1  ;;  %s1081_s16 = sshll.u32 %s1480_s30, 2  ;;  %s1113_s18 = sshll.u32 %s1482_s10, 6  ;;  %vm579_vm2 = vcmask 130048   ;;  %vm623_vm3 = vcmask 261120   ;;  %vm656_vm4 = vcmask 257024  }
  0x10   : > { %1135 = vmatprep.subr.bf16.mxu1 %v1264_v1  ;;  %1207 = vset.pattern.permute.xlu1 %v1263_v0  ;;  %v642_v3 = vshrl.u32 %v561_v2, 7  ;;  %s1354_s17 = sadd.s32 %s1081_s16, %s1482_s10  ;;  %s1361_s22 = scalar_lea.vmem %s1464_s5, %s1113_s18  ;;  %v562_v10 = vand.u32 127, %v561_v2  ;;  %658 = vst.msk [vmem:[#allocation3] sm:$0xff] %vm623_vm3, %v1264_v1 }
  0x11   : > { %s1082_s19 = sshll.u32 %s1354_s17, 3  ;;  %s512_s28 = scalar_lea.vmem %s1462_s3, %s1480_s30  ;;  %1131 = vmatprep.mubr.msk.bf16.mxu0 %vm1265_vm0, %v1264_v1  ;;  %1151 = vmatprep.mubr.msk.bf16.mxu1 %vm1265_vm0, %v1264_v1  ;;  %v1209_v19 = vld [vmem:[%s1361_s22 + $0x38] sm:$0xff]   ;;  %v1210_v21 = vld [vmem:[%s1361_s22 + $0x30] sm:$0xff]   ;;  %v1211_v23 = vld [vmem:[%s1361_s22 + $0x28] sm:$0xff]  }
  0x12   : > { %s501_s25 = scalar_lea.vmem %s1459_s0, %s1082_s19  ;;  %v643_v5 = vsub.s32 0, %v642_v3  ;;  %v638_v6 = vld [vmem:[%s512_s28] sm:$0x1]  ;;  %s1112_s29 = sshll.u32 %s1480_s30, 3  ;;  %v749_v20 = vsel %vm623_vm3, %v1209_v19, 0  ;;  %v746_v22 = vsel %vm623_vm3, %v1210_v21, 0 }
  0x13   : > { %v563_v4 = vld [vmem:[%s501_s25] sm:$0xff]  ;;  %v639_v7 = vadd.f32 1.0, %v638_v6  ;;  %s506_s20 = scalar_lea.vmem %s1460_s1, %s1112_s29  ;;  %1136 = vmatpush3.bf16.xpose.msra.mxu1 %v749_v20  ;;  %v743_v24 = vsel %vm623_vm3, %v1211_v23, 0  ;;  %v1213_v32 = vld [vmem:[%s1361_s22 + $0x18] sm:$0xff]   ;;  %v1214_v34 = vld [vmem:[%s1361_s22 + $0x10] sm:$0xff]   ;;  %s509_s24 = scalar_lea.vmem %s1461_s2, %s1480_s30 }
  0x14   : > { %565 = vperm.xlu0 %1206, %v563_v4   ;;  %v1208_v8 = vld [vmem:[%s506_s20] sm:$0xff]   ;;  %1137 = vmatprep.subr.bf16.mxu1 %v1264_v1  ;;  %v737_v33 = vsel %vm623_vm3, %v1213_v32, 0  ;;  %v734_v35 = vsel %vm623_vm3, %v1214_v34, 0  ;;  %v1215_v36 = vld [vmem:[%s1361_s22 + $0x8] sm:$0xff]   ;;  %s520_s29 = scalar_lea.vmem %s1463_s4, %s1082_s19  ;;  %s536_s20 = scalar_lea.vmem %s1465_s6, %s1482_s10 }
  0x15   : > { %v1380_v9 = vrot.slane %v639_v7, %v643_v5  ;;  %1130 = vmatpush3.bf16.msra.mxu0 %v1208_v8  ;;  %v1212_v25 = vld [vmem:[%s1361_s22 + $0x20] sm:$0xff]   ;;  %v731_v37 = vsel %vm623_vm3, %v1215_v36, 0  ;;  %s547_s23 = scalar_lea.vmem %s1467_s8, %s1482_s10 }
  0x16   : > { %1155 = vmatprep.subr.bf16.mxu0 %v1264_v1  ;;  %v740_v26 = vsel %vm623_vm3, %v1212_v25, 0  ;;  %v1216_v38 = vld [vmem:[%s1361_s22] sm:$0xff]   ;;  %s1114_s22 = sshll.u32 %s1482_s10, 4 }
  0x17   : > { %v728_v39 = vsel %vm623_vm3, %v1216_v38, 0  ;;  %v1096_v45 = vld [vmem:[%s509_s24] ss:$0 sm:$0xff]  ;;  %s544_s30 = scalar_lea.vmem %s1466_s7, %s1114_s22  ;;  %v800_v5 = vld [vmem:[#allocation3] sm:$0xff]  ;;  %s1092_s24 = sshll.u32 %s1354_s17, 2 }
  0x18   : > { %v1217_v50 = vld [vmem:[%s544_s30 + $0x8] sm:$0xff]   ;;  %v1218_v51 = vld [vmem:[%s544_s30] sm:$0xff]   ;;  %s555_s26 = scalar_lea.vmem %s1468_s9, %s1092_s24 }
  0x19   : > { %v872_v52 = vld [vmem:[%s520_s29] sm:$0xff] }
  0x1a   : > { %v1097_v53 = vld [vmem:[%s536_s20] ss:$0 sm:$0xff] }
  0x1b   : > { %1138 = vmatpush3.bf16.xpose.msra.mxu1 %v746_v22 }
  0x1c   : > { %1139 = vmatprep.subr.bf16.mxu1 %v1264_v1 }
  0x23   : > { %1140 = vmatpush3.bf16.xpose.msra.mxu1 %v743_v24 }
  0x24   : > { %1141 = vmatprep.subr.bf16.mxu1 %v1264_v1 }
  0x2b   : > { %1142 = vmatpush3.bf16.xpose.msra.mxu1 %v740_v26 }
  0x2c   : > { %1143 = vmatprep.subr.bf16.mxu1 %v1264_v1 }
  0x33   : > { %1144 = vmatpush3.bf16.xpose.msra.mxu1 %v737_v33 }
  0x34   : > { %1145 = vmatprep.subr.bf16.mxu1 %v1264_v1 }
  0x3b   : > { %1146 = vmatpush3.bf16.xpose.msra.mxu1 %v734_v35 }
  0x3c   : > { %1147 = vmatprep.subr.bf16.mxu1 %v1264_v1 }
  0x43   : > { %1148 = vmatpush3.bf16.xpose.msra.mxu1 %v731_v37 }
  0x44   : > { %1149 = vmatprep.subr.bf16.mxu1 %v1264_v1 }
  0x4b   : > { %1150 = vmatpush3.bf16.xpose.msra.mxu1 %v728_v39 }
  0x8f   : > { %v566_v11 = vpop.permute.xlu0 %565 }
  0x90   : > { %vm567_vm1 = vcmp.eq.s32.totalorder %v562_v10, %v566_v11  ;;  %v1109_v11 = vld [vmem:[%s547_s23] ss:$0 sm:$0xff] }
  0x91   : > { %v1093_v12 = vsel %vm567_vm1, 1.0, %v1264_v1 }
  0x92   : > { %v570_v13 = vpack.c.bf16 %v1093_v12, %v1093_v12 }
  0x94   : > { %1132 = vmatmul.mubr.msk.bf16.vlgmr.msra.gmra.mxu0 %vm579_vm2, %v570_v13 }
  0x95   : > { %1159 = vmatprep.mubr.msk.bf16.mxu0 %vm1265_vm0, %v1264_v1  ;;  %1156 = vmatpush3.bf16.xpose.msra.mxu0 %v1217_v50 }
  0x96   : > { %1157 = vmatprep.subr.bf16.mxu0 %v1264_v1 }
  0x9d   : > { %1158 = vmatpush3.bf16.xpose.msra.mxu0 %v1218_v51 }
 0x154   : > { %v617_v14 = vpop.f32.mrf.mxu0 }
 0x155   : > { %v624_v15 = vsel %vm623_vm3, %v617_v14, 0.0 }
 0x156   : > { %625 = vadd.xlane.f32.xlu0 %v624_v15  ;;  %v1133_v16 = vpop.f32.mrf.mxu0 }
 0x158   : > { %v620_v17 = vpop.f32.mrf.mxu0 }
 0x15a   : > { %v1134_v18 = vpop.f32.mrf.mxu0 }
 0x1df   : > { %v626_v27 = vpop.xlane.xlu0 %625 }
 0x1e0   : > { %v628_v28 = vmul.f32 0.03125, %v626_v27 }
 0x1e2   : > { %v629_v29 = vsub.f32 %v617_v14, %v628_v28 }
 0x1e4   : > { %v630_v30 = vmul.f32 %v629_v29, %v629_v29 }
 0x1e6   : > { %v631_v31 = vsel %vm623_vm3, %v630_v30, 0.0 }
 0x1e7   : > { %632 = vadd.xlane.f32.xlu1 %v631_v31 }
 0x1f8   : > { %875 = vperm.xlu1 %1207, %v872_v52  }
 0x270   : > { %v633_v40 = vpop.xlane.xlu1 %632 }
 0x271   : > { %v634_v41 = vmul.f32 0.03125, %v633_v40 }
 0x273   : > { %v635_v42 = vadd.f32 1e-06, %v634_v41 }
 0x274   : > { %v876_v12 = vpop.permute.xlu1 %875 }
 0x275   : > { %1219 = vrsqrt.f32 %v635_v42 }
 0x282   : > { %v1220_v43 = vpop.eup %1219 }
 0x283   : > { %v637_v44 = vmul.f32 %v1220_v43, %v629_v29 }
 0x285   : > { %v646_v46 = vmul.f32 %v1380_v9, %v637_v44 }
 0x287   : > { %v654_v47 = vadd.f32 %v1096_v45, %v646_v46 }
 0x289   : > { %v655_v48 = vpack.c.bf16 %v654_v47, %v654_v47 }
 0x28b   : > { %657 = vst.msk [vmem:[#allocation2] sm:$0xf] %vm656_vm4, %v655_v48 }
 0x292   : > { %v659_v49 = vld [vmem:[#allocation2] sm:$0xf] }
 0x293   : > { %1152 = vmatmul.mubr.msk.bf16.vlgmr.msra.gmra.mxu1 %vm623_vm3, %v659_v49 }
 0x353   : > { %v785_v54 = vpop.f32.mrf.mxu1 }
 0x354   : > { %v786_v55 = vadd.f32 %v1097_v53, %v785_v54 }
 0x355   : > { %v1153_v56 = vpop.f32.mrf.mxu1 }
 0x356   : > { %v792_v57 = vmul.f32 0.044715, %v786_v55  ;;  %v791_v1 = vmul.f32 0.5, %v786_v55 }
 0x357   : > { %v788_v58 = vpop.f32.mrf.mxu1 }
 0x358   : > { %v793_v59 = vmul.f32 %v792_v57, %v786_v55 }
 0x359   : > { %v1154_v60 = vpop.f32.mrf.mxu1 }
 0x35a   : > { %v794_v61 = vmul.f32 %v793_v59, %v786_v55 }
 0x35c   : > { %v795_v62 = vadd.f32 %v794_v61, %v786_v55 }
 0x35e   : > { %v796_v63 = vmul.f32 0.7978846, %v795_v62 }
 0x360   : > { %1221 = vtanh.f32 %v796_v63 }
 0x36d   : > { %v1222_v0 = vpop.eup %1221 }
 0x36e   : > { %v798_v2 = vadd.f32 1.0, %v1222_v0 }
 0x370   : > { %v799_v3 = vmul.f32 %v798_v2, %v791_v1 }
 0x372   : > { %v801_v4 = vpack.c.bf16 %v799_v3, %v799_v3 }
 0x374   : > { %1160 = vmatmul.mubr.bf16.vlgmr.msra.gmra.mxu0 %v801_v4 }
 0x434   : > { %v852_v6 = vpop.f32.mrf.mxu0 }
 0x435   : > { %v858_v7 = vadd.f32 %v852_v6, %v800_v5 }
 0x436   : > { %v1161_v8 = vpop.f32.mrf.mxu0 }
 0x437   : > { %859 = vst.msk [vmem:[#allocation3] sm:$0xff] %vm623_vm3, %v858_v7 }
 0x438   : > { %v855_v9 = vpop.f32.mrf.mxu0 }
 0x43a   : > { %v1162_v10 = vpop.f32.mrf.mxu0 }
 0x43e   : > { %v863_v13 = vld [vmem:[#allocation3] sm:$0xff] }
 0x43f   : > { %v871_v14 = vadd.f32 %v1109_v11, %v863_v13 }
 0x441   : > { %v878_v15 = vmul.f32 %v876_v12, %v871_v14 }
 0x443   : > { %v879_v16 = vpack.c.bf16 %v878_v15, %v878_v15 }
 0x445   : > { %881 = vst.msk [vmem:[%s555_s26] sm:$0xf] %vm656_vm4, %v879_v16 }
 0x446 PF: > { %s19_s13 = sadd.s32 1, %s1261_s13   ;;  %s1469_s30 = smov %s1253_s11 }
 0x447   : > { %p16_p7 = scmp.ge.s32.totalorder %s19_s13, 10   ;;  %s1470_s10 = smov %s1257_s12 }
 0x448   : > { %s1471_s11 = smov %s1474_s14  ;;  %s1472_s12 = smov %s1478_s15 }
 0x449   :  { %18 = sbr.rel (!%p16_p7) target bundleno = 3 (0x3), region = 118 }

// kernel: dit_block_forward.7
= control target key start
LH: loop header
LB: loop body
LE: loop exit
PB: predicated region body
PF: predicated region fallthrough
CT: control target
= control target key end

     0   :  { %9 = vsyncpa [#allocation3], 0  ;;  %s1065_s0 = inlined_call_operand.vmem [shape: s32[2,4,8], index: 0, kind: input, shape index: {}]   ;;  %s1066_s1 = inlined_call_operand.vmem [shape: bf16[2,4,8,32], index: 1, kind: input, shape index: {}]   ;;  %s1067_s2 = inlined_call_operand.vmem [shape: f32[2,16,32], index: 2, kind: input, shape index: {}]   ;;  %s1068_s3 = inlined_call_operand.vmem [shape: f32[2,1,32], index: 3, kind: input, shape index: {}]   ;;  %s1069_s4 = inlined_call_operand.hbm [shape: f32[2,16,32], index: 4, kind: output, shape index: {}]  }
   0x1   :  { %11 = vsyncpa [#allocation3 + $0x1], 0  ;;  %s917_s15 = smov 0   ;;  %s919_s16 = smov 0  }
   0x2   :  { %s921_s17 = smov 0   ;;  %s923_s18 = smov 0  }
   0x3   :  { %s925_s19 = smov 0   ;;  %s927_s20 = smov 0  }
   0x4 LB: > { %s679_s21 = sadd.s32 4294967295, %s885_s20   ;;  %s680_s22 = sadd.s32 4294967294, %s885_s20   ;;  %s885_s20 = sphi %s927_s20, %s17_s20   ;;  %s881_s19 = sphi %s925_s19, %s1076_s19   ;;  %s877_s18 = sphi %s923_s18, %s1075_s18   ;;  %s873_s17 = sphi %s921_s17, %s1074_s17   ;;  %s869_s16 = sphi %s919_s16, %s1073_s16   ;;  %s865_s15 = sphi %s917_s15, %s1072_s15  }
   0x5   : > { %s29_s23 = sadd.s32 1, %s881_s19  ;;  %s144_s24 = sadd.s32 1, %s873_s17 }
   0x6   : > { %p31_p0 = scmp.ge.s32.totalorder %s29_s23, 2  ;;  %p154_p1 = scmp.ne.s32.totalorder %s873_s17, %s869_s16 }
   0x7   : > { %p155_p2 = scmp.eq.s32.totalorder %s679_s21, 1  ;;  %p160_p3 = scmp.ne.s32.totalorder %s869_s16, %s865_s15 }
   0x8   : > { %s1078_s23 = smov (%p31_p0, %s29_s23), 0  ;;  %p161_p5 = scmp.eq.s32.totalorder %s680_s22, 1 }
   0x9   : > { %p957_p4 = por %p155_p2, %p154_p1  ;;  %s139_s26 = ssub.s32 %s881_s19, %s1078_s23 }
   0xa   : > { %p683_p6 = scmp.ge.s32.totalorder %s885_s20, 1  ;;  %p142_p7 = scmp.eq.s32.totalorder %s139_s26, 0 }
   0xb   : > { %p964_p8 = por %p161_p5, %p160_p3  ;;  %p213_p9 = scmp.lt.s32.totalorder %s885_s20, 3 }
   0xc   : > { %s970_s28 = scalar_select %p142_p7, %s873_s17, %s144_s24  }
   0xd   : > { %p214_p10 = pnand %p683_p6, %p213_p9 }
   0xe   : > { %p255_p11 = scmp.lt.s32.totalorder (!%p214_p10), %s877_s18, 1  ;;  %s252_s21 = sand.u32 (!%p214_p10), 1, %s869_s16  }
   0xf   : > { %217 = sbr.rel (%p214_p10) target bundleno = 257 (0x101), region = 36  ;;  %s1020_s10 = scalar_lea.sflag (!%p214_p10), [#allocation3], %s252_s21 }
  0x14   : > { %v280_v0 = vlaneseq  ;;  %v887_v1 = vmov 0.0   ;;  %s974_s29 = scalar_select %p255_p11, %s877_s18, 1  ;;  %vm888_vm0 = vmmov 0   ;;  %vm317_vm1 = vcmask 1043456  }
  0x15   : > { %726 = vmatprep.subr.bf16.mxu0 %v887_v1  ;;  %732 = vmatprep.subr.bf16.mxu1 %v887_v1  ;;  %vm313_vm2 = vcmask 64512   ;;  %vm548_vm11 = vcmask 261120  }
  0x16   : > { %728 = vmatprep.mubr.msk.bf16.mxu0 %vm888_vm0, %v887_v1  ;;  %734 = vmatprep.mubr.msk.bf16.mxu1 %vm888_vm0, %v887_v1  ;;  %v281_v2 = vshrl.u32 %v280_v0, 7  ;;  %s715_s30 = sshll.u32 %s974_s29, 4  ;;  %s685_s5 = sshll.u32 %s974_s29, 2 }
  0x17   : > { %s263_s8 = scalar_lea.vmem %s1066_s1, %s715_s30  ;;  %s258_s11 = scalar_lea.vmem %s1065_s0, %s685_s5 }
  0x18   : > { %v282_v3 = vadd.s32 8, %v281_v2  ;;  %v696_v4 = vld [vmem:[%s263_s8 + $0x4] sm:$0xf]  ;;  %v298_v5 = vld [vmem:[%s263_s8] sm:$0xf]  ;;  %s276_s14 = scalar_lea.vmem %s1068_s3, %s974_s29  ;;  %s272_s26 = scalar_lea.vmem %s1067_s2, %s715_s30 }
  0x19   : > { %v693_v6 = vld [vmem:[%s258_s11 + $0x1] ss:$0 sm:$0xff]  ;;  %v319_v7 = vsel %vm317_vm1, %v696_v4, 0  ;;  %v366_v8 = vsel %vm317_vm1, %v298_v5, 0  ;;  %v690_v9 = vld [vmem:[%s258_s11] ss:$0 sm:$0xff] }
  0x1a   : > { %vm304_vm3 = vcmp.eq.s32.totalorder %v281_v2, %v693_v6  ;;  %vm305_vm4 = vcmp.eq.s32.totalorder %v282_v3, %v693_v6  ;;  %v702_v10 = vld [vmem:[%s263_s8 + $0x8] sm:$0xf]  ;;  %727 = vmatpush3.bf16.msra.mxu0 %v319_v7  ;;  %733 = vmatpush3.bf16.msra.mxu1 %v366_v8  ;;  %vm291_vm5 = vcmp.eq.s32.totalorder %v281_v2, %v690_v9  ;;  %v707_v13 = vld [vmem:[%s263_s8 + $0xc] sm:$0xf]  ;;  %v699_v14 = vld [vmem:[%s258_s11 + $0x2] ss:$0 sm:$0xff] }
  0x1b   : > { %v694_v11 = vsel %vm304_vm3, 1.0, %v887_v1  ;;  %v695_v12 = vsel %vm305_vm4, 1.0, %v887_v1  ;;  %vm292_vm6 = vcmp.eq.s32.totalorder %v282_v3, %v690_v9  ;;  %v691_v16 = vsel %vm291_vm5, 1.0, %v887_v1  ;;  %738 = vmatprep.subr.bf16.mxu0 %v887_v1  ;;  %744 = vmatprep.subr.bf16.mxu1 %v887_v1  ;;  %v704_v19 = vld [vmem:[%s258_s11 + $0x3] ss:$0 sm:$0xff]  ;;  %s684_s5 = sshll.u32 %s252_s21, 4 }
  0x1c   : > { %v310_v15 = vpack.c.bf16 %v695_v12, %v694_v11  ;;  %v692_v17 = vsel %vm292_vm6, 1.0, %v887_v1  ;;  %v427_v18 = vsel %vm317_vm1, %v702_v10, 0  ;;  %v490_v21 = vsel %vm317_vm1, %v707_v13, 0  ;;  %v709_v40 = vld [vmem:[%s276_s14] ss:$0 sm:$0xff]  ;;  %s717_s29 = sshll.u32 %s877_s18, 8 }
  0x1d   : > { %v297_v20 = vpack.c.bf16 %v692_v17, %v691_v16  ;;  %vm414_vm7 = vcmp.eq.s32.totalorder %v281_v2, %v699_v14  ;;  %vm415_vm8 = vcmp.eq.s32.totalorder %v282_v3, %v699_v14  ;;  %vm477_vm9 = vcmp.eq.s32.totalorder %v281_v2, %v704_v19  ;;  %v535_v45 = vld [vmem:[%s272_s26] sm:$0xff]  ;;  %s254_s30 = scalar_lea.vmem [#allocation2], %s684_s5  ;;  %v536_v54 = vld [vmem:[%s272_s26 + $0x8] sm:$0xff]  ;;  %s1014_s9 = scalar_lea.hbm %s1069_s4, %s717_s29 }
  0x1e   : > { %729 = vmatmul.mubr.msk.bf16.vlgmr.msra.gmra.mxu0 %vm313_vm2, %v310_v15  ;;  %vm478_vm10 = vcmp.eq.s32.totalorder %v282_v3, %v704_v19  ;;  %v700_v22 = vsel %vm414_vm7, 1.0, %v887_v1  ;;  %v701_v23 = vsel %vm415_vm8, 1.0, %v887_v1  ;;  %v705_v24 = vsel %vm477_vm9, 1.0, %v887_v1  ;;  %s567_s6 = sshll.u32 %s254_s30, 4  ;;  %s889_s11 = smov [#allocation2]   ;;  %s1016_s6 = int_to_ptr.vmem [resolvable:$true] %s567_s6 }
  0x1f   : > { %735 = vmatmul.mubr.msk.bf16.vlgmr.msra.gmra.mxu1 %vm313_vm2, %v297_v20  ;;  %739 = vmatpush3.bf16.msra.mxu0 %v427_v18  ;;  %v706_v25 = vsel %vm478_vm10, 1.0, %v887_v1  ;;  %v420_v26 = vpack.c.bf16 %v701_v23, %v700_v22  ;;  %s809_s18 = scalar_lea.vmem %s1016_s6, 256  ;;  %s813_s12 = sshll.u32 %s889_s11, 4  ;;  %s814_s12 = int_to_ptr.vmem [resolvable:$false] %s813_s12 }
  0x20   : > { %745 = vmatpush3.bf16.msra.mxu1 %v490_v21  ;;  %740 = vmatprep.mubr.msk.bf16.mxu0 %vm888_vm0, %v887_v1  ;;  %v483_v27 = vpack.c.bf16 %v706_v25, %v705_v24  ;;  %p810_p12 = scmp.ne.s32.totalorder %s1016_s6, %s809_s18  ;;  %s815_s13 = scalar_lea.vmem %s814_s12, 512 }
  0x21   : > { %746 = vmatprep.mubr.msk.bf16.mxu1 %vm888_vm0, %v887_v1  ;;  %p816_p1 = scmp.lt.s32.totalorder %s1016_s6, %s814_s12  ;;  %p817_p2 = scmp.lt.s32.totalorder %s815_s13, %s809_s18 }
  0x22   : > { %p811_p13 = pnand %p810_p12, %p957_p4 }
  0x23   : > { %p818_p3 = por %p817_p2, %p816_p1 }
  0x24   : > { %p812_p0 = pneg %p811_p13 }
  0x26   : > { %741 = vmatmul.mubr.msk.bf16.vlgmr.msra.gmra.mxu0 %vm313_vm2, %v420_v26  ;;  %p819_p5 = pnand %p818_p3, %p812_p0 }
  0x27   : > { %747 = vmatmul.mubr.msk.bf16.vlgmr.msra.gmra.mxu1 %vm313_vm2, %v483_v27 }
  0xde   : > { %v355_v28 = vpop.f32.mrf.mxu0 }
  0xdf   : > { %v402_v29 = vpop.f32.mrf.mxu1 }
  0xe0   : > { %v730_v30 = vpop.f32.mrf.mxu0  ;;  %v403_v35 = vadd.f32 %v402_v29, %v355_v28 }
  0xe1   : > { %v736_v31 = vpop.f32.mrf.mxu1 }
  0xe2   : > { %v358_v32 = vpop.f32.mrf.mxu0 }
  0xe3   : > { %v405_v33 = vpop.f32.mrf.mxu1 }
  0xe4   : > { %v731_v34 = vpop.f32.mrf.mxu0  ;;  %v406_v42 = vadd.f32 %v405_v33, %v358_v32 }
  0xe5   : > { %v737_v36 = vpop.f32.mrf.mxu1 }
  0xe6   : > { %v463_v37 = vpop.f32.mrf.mxu0 }
  0xe7   : > { %v470_v38 = vadd.f32 %v463_v37, %v403_v35  ;;  %v526_v39 = vpop.f32.mrf.mxu1 }
  0xe8   : > { %v742_v41 = vpop.f32.mrf.mxu0 }
  0xe9   : > { %v533_v43 = vadd.f32 %v526_v39, %v470_v38  ;;  %v748_v44 = vpop.f32.mrf.mxu1 }
  0xea   : > { %v466_v46 = vpop.f32.mrf.mxu0 }
  0xeb   : > { %v544_v47 = vmul.f32 %v709_v40, %v533_v43  ;;  %v471_v48 = vadd.f32 %v466_v46, %v406_v42  ;;  %v529_v49 = vpop.f32.mrf.mxu1 }
  0xec   : > { %v743_v50 = vpop.f32.mrf.mxu0 }
  0xed   : > { %v546_v51 = vadd.f32 %v544_v47, %v535_v45  ;;  %v534_v52 = vadd.f32 %v529_v49, %v471_v48  ;;  %v749_v53 = vpop.f32.mrf.mxu1 }
  0xef   : > { %549 = vst.msk [vmem:[%s254_s30] sm:$0xff] %vm548_vm11, %v546_v51  ;;  %v545_v55 = vmul.f32 %v709_v40, %v534_v52 }
  0xf1   : > { %v547_v56 = vadd.f32 %v545_v55, %v536_v54 }
  0xf3   : > { %550 = vst.msk [vmem:[%s254_s30 + $0x8] sm:$0xff] %vm548_vm11, %v547_v56 }
  0xf4   : > { %822 = shalt.err (!%p819_p5)
}
  0xf5   : > { %s823_s14 = scalar_lea.hbm %s1014_s9, 256  ;;  %s827_s24 = scalar_lea.hbm %s1069_s4, 512 }
  0xf6   : > { %p824_p6 = scmp.ne.s32.totalorder %s1014_s9, %s823_s14  ;;  %p828_p10 = scmp.lt.s32.totalorder %s1014_s9, %s1069_s4 }
  0xf7   : > { %p829_p11 = scmp.lt.s32.totalorder %s827_s24, %s823_s14 }
  0xf8   : > { %p825_p7 = pnand %p824_p6, %p957_p4 }
  0xf9   : > { %p830_p12 = por %p829_p11, %p828_p10 }
  0xfa   : > { %p826_p9 = pneg %p825_p7 }
  0xfc   : > { %p831_p13 = pnand %p830_p12, %p826_p9 }
  0xfe   : > { %834 = shalt.err (!%p831_p13)
}
  0xff   : > { %s890_s29 = smov 128   ;;  %s891_s30 = smov 8  }
 0x100   : > { %750 = dma.vmem_to_hbm [thread:$0]  (%p957_p4), %s1016_s6, 256, %s1014_s9, %s1020_s10, %s890_s29, %s890_s29, %s891_s30  }
 0x101 PF: > { %p756_p0 = scmp.ge.s32.totalorder %s885_s20, 2  ;;  %s582_s7 = sand.u32 1, %s865_s15  }
 0x102   : > { %s583_s8 = scalar_lea.sflag [#allocation3], %s582_s7 }
 0x103   : > { %p753_p1 = pnand %p756_p0, %p964_p8 }
 0x105   : > { %p754_p2 = pneg %p753_p1 }
 0x107   : > { %860 = dma.done.wait (%p754_p2), %s583_s8, 256  }
 0x108   : > { %862 = vsyncadd (%p754_p2), %s583_s8, 4294967040  ;;  %s17_s20 = sadd.s32 1, %s885_s20   ;;  %s1072_s15 = smov %s869_s16 }
 0x109   : > { %p14_p3 = scmp.ge.s32.totalorder %s17_s20, 4   ;;  %s1073_s16 = smov %s873_s17 }
 0x10a   : > { %s1074_s17 = smov %s970_s28  ;;  %s1075_s18 = smov %s881_s19 }
 0x10b   : > { %s1076_s19 = smov %s1078_s23  ;;  %16 = sbr.rel (!%p14_p3) target bundleno = 4 (0x4), region = 83 }
 0x110   :  { %588 = vsyncpa [#allocation3], 1 }
 0x111   :  { %590 = vsyncpa [#allocation3 + $0x1], 1 }

// kernel: dit_block_forward.5
= control target key start
LH: loop header
LB: loop body
LE: loop exit
PB: predicated region body
PF: predicated region fallthrough
CT: control target
= control target key end

     0   :  { %s2856_s25 = smov 0   ;;  %s3245_s0 = inlined_call_operand.vmem [shape: f32[2,16,32], index: 0, kind: input, shape index: {}]   ;;  %s3246_s1 = inlined_call_operand.vmem [shape: f32[2,1,32], index: 1, kind: input, shape index: {}]   ;;  %s3247_s2 = inlined_call_operand.vmem [shape: f32[2,1,32], index: 2, kind: input, shape index: {}]   ;;  %s3248_s3 = inlined_call_operand.vmem [shape: f32[2,1,32], index: 3, kind: input, shape index: {}]   ;;  %s3249_s4 = inlined_call_operand.vmem [shape: f32[2,1,32], index: 4, kind: input, shape index: {}]   ;;  %s3250_s5 = inlined_call_operand.vmem [shape: f32[2,1,32], index: 5, kind: input, shape index: {}]   ;;  %s3251_s6 = inlined_call_operand.vmem [shape: f32[4,32], index: 6, kind: input, shape index: {}]   ;;  %s3252_s7 = inlined_call_operand.vmem [shape: bf16[96,32], index: 7, kind: input, shape index: {}]   ;;  %s3253_s8 = inlined_call_operand.vmem [shape: f32[1,96], index: 8, kind: input, shape index: {}]   ;;  %s3254_s9 = inlined_call_operand.vmem [shape: bf16[4,8,32], index: 9, kind: input, shape index: {}]   ;;  %s3255_s10 = inlined_call_operand.vmem [shape: f32[1,32], index: 10, kind: input, shape index: {}]   ;;  %s3256_s11 = inlined_call_operand.vmem [shape: f32[2,16,32], index: 11, kind: output, shape index: {0}]   ;;  %s3257_s12 = inlined_call_operand.vmem [shape: bf16[2,16,32], index: 12, kind: output, shape index: {1}]   ;;  %s3258_s13 = inlined_call_operand.vmem [shape: f32[2,4,16], index: 13, kind: output, shape index: {2}]  }
   0x1 LB: > { %s2513_s26 = sadd.s32 4294967295, %s2774_s25   ;;  %p2517_p0 = scmp.ge.s32.totalorder %s2774_s25, 1  ;;  %s2774_s25 = sphi %s2856_s25, %s24_s25  }
   0x2   : > { %p432_p1 = scmp.lt.s32.totalorder %s2774_s25, 3 }
   0x4   : > { %p433_p2 = pnand %p2517_p0, %p432_p1 }
   0x5   : > { %p500_p3 = scmp.lt.s32.totalorder (!%p433_p2), %s2513_s26, 1  ;;  %s2778_s21 = smov (!%p433_p2), 112  }
   0x6   : > { %436 = sbr.rel (%p433_p2) target bundleno = 2299 (0x8fb), region = 64  ;;  %s2779_s22 = smov (!%p433_p2), 120  }
   0x7   : > { %s2780_s23 = smov (!%p433_p2), 104   ;;  %s2781_s24 = smov (!%p433_p2), 96  }
   0x8   : > { %s2785_s28 = smov (!%p433_p2), 64  }
   0xb   : > { %s3260_s26 = smov (!%p500_p3, %s2513_s26), 1  ;;  %vm537_vm0 = vcmask 261120   ;;  %v2720_v4 = vld [vmem:[%s3252_s7 + $0x28] sm:$0xff]   ;;  %v2776_v5 = vmov 0.0   ;;  %v2721_v7 = vld [vmem:[%s3252_s7 + $0x20] sm:$0xff]   ;;  %v2722_v9 = vld [vmem:[%s3252_s7 + $0x18] sm:$0xff]   ;;  %v568_v33 = vlaneseq }
   0xc   : > { %s2568_s27 = sshll.u32 %s3260_s26, 4  ;;  %2607 = vmatprep.subr.bf16.mxu0 %v2776_v5  ;;  %2623 = vmatprep.subr.bf16.mxu1 %v2776_v5  ;;  %v653_v6 = vsel %vm537_vm0, %v2720_v4, 0  ;;  %v650_v8 = vsel %vm537_vm0, %v2721_v7, 0  ;;  %v647_v10 = vsel %vm537_vm0, %v2722_v9, 0  ;;  %v2723_v21 = vld [vmem:[%s3252_s7 + $0x10] sm:$0xff]   ;;  %v2724_v23 = vld [vmem:[%s3252_s7 + $0x8] sm:$0xff]   ;;  %s510_s15 = scalar_lea.vmem %s3247_s2, %s3260_s26 }
   0xd   : > { %s2872_s30 = scalar_lea.vmem %s3245_s0, %s2568_s27  ;;  %2608 = vmatpush3.bf16.xpose.msra.mxu0 %v653_v6  ;;  %v644_v22 = vsel %vm537_vm0, %v2723_v21, 0  ;;  %vm2777_vm1 = vmmov 0   ;;  %v641_v24 = vsel %vm537_vm0, %v2724_v23, 0  ;;  %v2725_v25 = vld [vmem:[%s3252_s7] sm:$0xff]   ;;  %v2920_v34 = vshrl.u32 %v568_v33, 7  ;;  %s507_s18 = scalar_lea.vmem %s3246_s1, %s3260_s26 }
   0xe   : > { %v535_v0 = vld [vmem:[%s2872_s30] sm:$0xff]  ;;  %v536_v1 = vld [vmem:[%s2872_s30 + $0x8] sm:$0xff]  ;;  %2609 = vmatprep.subr.bf16.mxu0 %v2776_v5  ;;  %2619 = vmatprep.mubr.msk.bf16.mxu0 %vm2777_vm1, %v2776_v5  ;;  %v638_v26 = vsel %vm537_vm0, %v2725_v25, 0  ;;  %v2782_v63 = vmov 1983009808   ;;  %v2784_v9 = vmov 0   ;;  %s524_s16 = scalar_lea.vmem %s3256_s11, %s2568_s27  ;;  %s519_s20 = scalar_lea.vmem %s3250_s5, %s3260_s26 }
   0xf   : > { %v538_v2 = vsel %vm537_vm0, %v535_v0, 0.0  ;;  %v541_v3 = vsel %vm537_vm0, %v536_v1, 0.0  ;;  %2625 = vmatprep.mubr.msk.bf16.mxu1 %vm2777_vm1, %v2776_v5  ;;  %v565_v35 = vld [vmem:[%s510_s15] sm:$0x1]  ;;  %v570_v37 = vsub.s32 0, %v2920_v34  ;;  %vm1520_vm2 = vcmask 64512  }
  0x10   : > { %539 = vadd.xlane.f32.xlu0 %v538_v2  ;;  %v566_v36 = vadd.f32 1.0, %v565_v35  ;;  %v2525_v44 = vld [vmem:[%s507_s18] ss:$0 sm:$0xff]  ;;  %v2783_v2 = vmov 1934713408   ;;  %vm1709_vm3 = vcmask 130048  }
  0x11   : > { %v2526_v49 = vld [vmem:[%s3253_s8] ss:$0 sm:$0xff]  ;;  %vm1989_vm4 = vcmask 1043456   ;;  %s2570_s29 = sshll.u32 %s3260_s26, 3  ;;  %vm2219_vm5 = vcmask 257024   ;;  %vm2347_vm6 = vcmask 125952  }
  0x12   : > { %v571_v40 = vrot.slane %v566_v36, %v570_v37  ;;  %s529_s19 = scalar_lea.vmem %s3257_s12, %s2570_s29  ;;  %s2524_s29 = sshll.u32 %s3260_s26, 2 }
  0x14   : > { %542 = vadd.xlane.f32.xlu0 %v541_v3  ;;  %v761_v3 = vunpack.c.l.s4 %v2783_v2 }
  0x15   : > { %2610 = vmatpush3.bf16.xpose.msra.mxu0 %v650_v8 }
  0x16   : > { %2611 = vmatprep.subr.bf16.mxu0 %v2776_v5 }
  0x1d   : > { %2612 = vmatpush3.bf16.xpose.msra.mxu0 %v647_v10  ;;  %v2955_v10 = vpack.i.b16 %v2784_v9, %v2784_v9 }
  0x1e   : > { %2613 = vmatprep.subr.bf16.mxu0 %v2776_v5 }
  0x25   : > { %2614 = vmatpush3.bf16.xpose.msra.mxu0 %v644_v22 }
  0x26   : > { %2615 = vmatprep.subr.bf16.mxu0 %v2776_v5 }
  0x2d   : > { %2616 = vmatpush3.bf16.xpose.msra.mxu0 %v641_v24 }
  0x2e   : > { %2617 = vmatprep.subr.bf16.mxu0 %v2776_v5 }
  0x35   : > { %2618 = vmatpush3.bf16.xpose.msra.mxu0 %v638_v26 }
  0x36   : > { %2659 = vmatprep.subr.bf16.mxu0 %v2776_v5 }
  0x99   : > { %v540_v11 = vpop.xlane.xlu0 %539 }
  0x9a   : > { %v545_v12 = vmul.f32 0.03125, %v540_v11 }
  0x9c   : > { %v547_v13 = vsub.f32 %v535_v0, %v545_v12  ;;  %v730_v0 = vunpack.c.l.s4 %v2782_v63 }
  0x9d   : > { %v543_v14 = vpop.xlane.xlu0 %542 }
  0x9e   : > { %v546_v15 = vmul.f32 0.03125, %v543_v14  ;;  %v549_v16 = vmul.f32 %v547_v13, %v547_v13  ;;  %v731_v4 = vunpack.c.0.s8 %v730_v0 }
  0xa0   : > { %v548_v17 = vsub.f32 %v536_v1, %v546_v15  ;;  %v551_v18 = vsel %vm537_vm0, %v549_v16, 0.0  ;;  %v2958_v15 = vsub.s32 %v731_v4, %v2920_v34 }
  0xa1   : > { %552 = vadd.xlane.f32.xlu1 %v551_v18 }
  0xa2   : > { %v550_v19 = vmul.f32 %v548_v17, %v548_v17 }
  0xa4   : > { %v554_v20 = vsel %vm537_vm0, %v550_v19, 0.0 }
  0xa5   : > { %555 = vadd.xlane.f32.xlu1 %v554_v20 }
 0x12a   : > { %v553_v27 = vpop.xlane.xlu1 %552 }
 0x12b   : > { %v557_v28 = vmul.f32 0.03125, %v553_v27 }
 0x12d   : > { %v559_v29 = vadd.f32 1e-06, %v557_v28 }
 0x12e   : > { %v556_v30 = vpop.xlane.xlu1 %555 }
 0x12f   : > { %2726 = vrsqrt.f32 %v559_v29  ;;  %v558_v31 = vmul.f32 0.03125, %v556_v30 }
 0x131   : > { %v560_v32 = vadd.f32 1e-06, %v558_v31 }
 0x133   : > { %2728 = vrsqrt.f32 %v560_v32 }
 0x13c   : > { %v2727_v38 = vpop.eup %2726 }
 0x13d   : > { %v563_v39 = vmul.f32 %v2727_v38, %v547_v13  ;;  %v762_v13 = vunpack.c.0.s8 %v761_v3 }
 0x13f   : > { %v573_v43 = vmul.f32 %v571_v40, %v563_v39  ;;  %v2962_v22 = vsub.s32 %v762_v13, %v2920_v34 }
 0x140   : > { %v2729_v41 = vpop.eup %2728 }
 0x141   : > { %v564_v42 = vmul.f32 %v2729_v41, %v548_v17  ;;  %v582_v46 = vadd.f32 %v2525_v44, %v573_v43 }
 0x143   : > { %v574_v45 = vmul.f32 %v571_v40, %v564_v42 }
 0x145   : > { %v583_v47 = vadd.f32 %v2525_v44, %v574_v45 }
 0x147   : > { %v584_v48 = vpack.c.bf16 %v583_v47, %v582_v46 }
 0x149   : > { %2620 = vmatmul.mubr.msk.bf16.vlgmr.msra.gmra.mxu0 %vm537_vm0, %v584_v48 }
 0x14a   : > { %2661 = vmatprep.mubr.msk.bf16.mxu0 %vm2777_vm1, %v2776_v5 }
 0x209   : > { %v689_v50 = vpop.f32.mrf.mxu0 }
 0x20a   : > { %v690_v52 = vadd.f32 %v2526_v49, %v689_v50 }
 0x20b   : > { %v2621_v51 = vpop.f32.mrf.mxu0 }
 0x20c   : > { %v696_v56 = vmul.f32 0.35355338, %v690_v52 }
 0x20d   : > { %v692_v53 = vpop.f32.mrf.mxu0 }
 0x20e   : > { %v693_v54 = vadd.f32 %v2526_v49, %v692_v53 }
 0x20f   : > { %v2622_v55 = vpop.f32.mrf.mxu0 }
 0x210   : > { %v697_v57 = vmul.f32 0.35355338, %v693_v54  ;;  %v2935_v58 = vpack.c.bf16 %v693_v54, %v690_v52 }
 0x212   : > { %v2937_v59 = vpack.c.bf16 %v697_v57, %v696_v56  ;;  %976 = vrot.lane.b32.xlu1 %v2935_v58, %s2778_s21  ;;  %974 = vrot.lane.b32.xlu0 %v2935_v58, %s2779_s22 }
 0x214   : > { %v710_v28 = vshrl.u32 %v2937_v59, 16 }
 0x216   : > { %978 = vrot.lane.b32.xlu1 %v2935_v58, %s2780_s23 }
 0x21a   : > { %980 = vrot.lane.b32.xlu1 %v2935_v58, %s2781_s24 }
 0x284   : > { %v2943_v60 = vpop.permute.xlu1 %976  ;;  %v2945_v61 = vpop.permute.xlu0 %974 }
 0x285   : > { %984 = vrot.lane.b32.xlu1 %v2943_v60, %s2781_s24  ;;  %982 = vrot.lane.b32.xlu0 %v2945_v61, %s2781_s24 }
 0x288   : > { %v2949_v62 = vpop.permute.xlu1 %978 }
 0x289   : > { %986 = vrot.lane.b32.xlu0 %v2949_v62, %s2781_s24  ;;  %700 = vrot.lane.b32.xlu1 %v2937_v59, %s2779_s22 }
 0x28c   : > { %v981_v1 = vpop.permute.xlu1 %980 }
 0x28d   : > { %702 = vrot.lane.b32.xlu0 %v2937_v59, %s2778_s21  ;;  %704 = vrot.lane.b32.xlu1 %v2937_v59, %s2780_s23  ;;  %v992_v8 = vshrl.u32 %v981_v1, 16  ;;  %s513_s23 = scalar_lea.vmem %s3248_s3, %s3260_s26 }
 0x2f7   : > { %v985_v6 = vpop.permute.xlu1 %984  ;;  %v983_v7 = vpop.permute.xlu0 %982 }
 0x2f8   : > { %v990_v11 = vpack.i.b16 %v983_v7, %v981_v1  ;;  %v993_v12 = vshrl.u32 %v983_v7, 16  ;;  %v1000_v20 = vshrl.u32 %v985_v6, 16 }
 0x2fa   : > { %v994_v14 = vpack.i.b16 %v993_v12, %v992_v8  ;;  %v1004_v17 = vcombine.high %v990_v11, %v2955_v10  ;;  %v1011_v26 = vrot.slane %v990_v11, %v2958_v15 }
 0x2fb   : > { %v987_v16 = vpop.permute.xlu0 %986  ;;  %v701_v19 = vpop.permute.xlu1 %700 }
 0x2fc   : > { %v998_v18 = vpack.i.b16 %v987_v16, %v985_v6  ;;  %v1001_v21 = vshrl.u32 %v987_v16, 16  ;;  %v1070_v23 = vcombine.high %v994_v14, %v2955_v10  ;;  %v711_v29 = vshrl.u32 %v701_v19, 16 }
 0x2fd   : > { %v1018_v30 = vrot.slane %v1004_v17, %v2958_v15  ;;  %v1077_v31 = vrot.slane %v994_v14, %v2958_v15  ;;  %v708_v33 = vpack.i.b16 %v701_v19, %v2937_v59 }
 0x2fe   : > { %v1019_v24 = vcombine.high %v998_v18, %v2955_v10  ;;  %v1026_v25 = vrot.slane %v998_v18, %v2958_v15  ;;  %v1002_v27 = vpack.i.b16 %v1001_v21, %v1000_v20  ;;  %v1084_v40 = vrot.slane %v1070_v23, %v2958_v15 }
 0x2ff   : > { %v703_v43 = vpop.permute.xlu0 %702  ;;  %v712_v47 = vpack.i.b16 %v711_v29, %v710_v28  ;;  %v705_v48 = vpop.permute.xlu1 %704  ;;  %v728_v51 = vcombine.high %v708_v33, %v2955_v10  ;;  %v735_v2 = vrot.slane %v708_v33, %v2958_v15 }
 0x300   : > { %v1033_v32 = vrot.slane %v1019_v24, %v2958_v15  ;;  %v1034_v35 = vcombine.low %v1011_v26, %v1026_v25  ;;  %v1035_v36 = vcombine.high %v1011_v26, %v1026_v25  ;;  %v1085_v38 = vcombine.high %v1002_v27, %v2955_v10 }
 0x301   : > { %v1092_v39 = vrot.slane %v1002_v27, %v2958_v15  ;;  %v718_v55 = vshrl.u32 %v703_v43, 16  ;;  %v716_v63 = vpack.i.b16 %v705_v48, %v703_v43  ;;  %v794_v3 = vcombine.high %v712_v47, %v2955_v10 }
 0x302   : > { %v1050_v41 = vcombine.low %v1018_v30, %v1033_v32  ;;  %v1051_v42 = vcombine.high %v1018_v30, %v1033_v32  ;;  %v1099_v44 = vrot.slane %v1085_v38, %v2958_v15  ;;  %v1042_v52 = vrot.slane %v1034_v35, %v2962_v22 }
 0x303   : > { %v1100_v45 = vcombine.low %v1077_v31, %v1092_v39  ;;  %v1101_v46 = vcombine.high %v1077_v31, %v1092_v39  ;;  %v1049_v53 = vrot.slane %v1035_v36, %v2962_v22  ;;  %v742_v4 = vrot.slane %v728_v51, %v2958_v15 }
 0x304   : > { %v1058_v49 = vrot.slane %v1050_v41, %v2962_v22  ;;  %v1065_v50 = vrot.slane %v1051_v42, %v2962_v22  ;;  %v1116_v54 = vcombine.low %v1084_v40, %v1099_v44  ;;  %v1117_v59 = vcombine.high %v1084_v40, %v1099_v44 }
 0x305   : > { %v1108_v56 = vrot.slane %v1100_v45, %v2962_v22  ;;  %v1115_v57 = vrot.slane %v1101_v46, %v2962_v22  ;;  %v719_v6 = vshrl.u32 %v705_v48, 16  ;;  %v743_v7 = vcombine.high %v716_v63, %v2955_v10 }
 0x306   : > { %v1152_v0 = vcombine.low %v1058_v49, %v1065_v50  ;;  %v2539_v1 = vcombine.high %v1058_v49, %v1065_v50  ;;  %v750_v8 = vrot.slane %v716_v63, %v2958_v15  ;;  %v1124_v9 = vrot.slane %v1116_v54, %v2962_v22 }
 0x307   : > { %v1136_v11 = vcombine.low %v1042_v52, %v1049_v53  ;;  %v2538_v12 = vcombine.high %v1042_v52, %v1049_v53  ;;  %v801_v13 = vrot.slane %v712_v47, %v2958_v15  ;;  %v1131_v14 = vrot.slane %v1117_v59, %v2962_v22 }
 0x308   : > { %v1186_v16 = vcombine.low %v1108_v56, %v1115_v57  ;;  %v720_v17 = vpack.i.b16 %v719_v6, %v718_v55  ;;  %v757_v18 = vrot.slane %v743_v7, %v2958_v15  ;;  %v2540_v19 = vcombine.high %v1108_v56, %v1115_v57 }
 0x309   : > { %v808_v20 = vrot.slane %v794_v3, %v2958_v15  ;;  %v1159_v21 = vrot.slane %v1152_v0, %v2958_v15  ;;  %v1167_v23 = vrot.slane %v2539_v1, %v2958_v15  ;;  %v758_v24 = vcombine.low %v735_v2, %v750_v8 }
 0x30a   : > { %v759_v25 = vcombine.high %v735_v2, %v750_v8  ;;  %v774_v26 = vcombine.low %v742_v4, %v757_v18  ;;  %v775_v27 = vcombine.high %v742_v4, %v757_v18  ;;  %v809_v28 = vcombine.high %v720_v17, %v2955_v10 }
 0x30b   : > { %v816_v29 = vrot.slane %v720_v17, %v2958_v15  ;;  %v1143_v30 = vrot.slane %v1136_v11, %v2958_v15  ;;  %v1151_v31 = vrot.slane %v2538_v12, %v2958_v15  ;;  %v1193_v35 = vrot.slane %v1186_v16, %v2958_v15 }
 0x30c   : > { %v782_v32 = vrot.slane %v774_v26, %v2962_v22  ;;  %v789_v33 = vrot.slane %v775_v27, %v2962_v22  ;;  %v1202_v36 = vcombine.low %v1124_v9, %v1131_v14  ;;  %v823_v38 = vrot.slane %v809_v28, %v2958_v15 }
 0x30d   : > { %v824_v39 = vcombine.low %v801_v13, %v816_v29  ;;  %v825_v40 = vcombine.high %v801_v13, %v816_v29  ;;  %v1176_v41 = vcombine.low %v1159_v21, %v1167_v23  ;;  %v766_v42 = vrot.slane %v758_v24, %v2962_v22 }
 0x30e   : > { %v773_v43 = vrot.slane %v759_v25, %v2962_v22  ;;  %v876_v44 = vcombine.low %v782_v32, %v789_v33  ;;  %v1201_v45 = vrot.slane %v2540_v19, %v2958_v15  ;;  %v840_v48 = vcombine.low %v808_v20, %v823_v38 }
 0x30f   : > { %v832_v46 = vrot.slane %v824_v39, %v2962_v22  ;;  %v839_v47 = vrot.slane %v825_v40, %v2962_v22  ;;  %v841_v49 = vcombine.high %v808_v20, %v823_v38  ;;  %v2535_v50 = vcombine.high %v782_v32, %v789_v33 }
 0x310   : > { %v1168_v51 = vcombine.low %v1143_v30, %v1151_v31  ;;  %v1209_v52 = vrot.slane %v1202_v36, %v2958_v15  ;;  %v2541_v53 = vcombine.high %v1124_v9, %v1131_v14  ;;  %v848_v54 = vrot.slane %v840_v48, %v2962_v22 }
 0x311   : > { %v855_v55 = vrot.slane %v841_v49, %v2962_v22  ;;  %v910_v56 = vcombine.low %v832_v46, %v839_v47  ;;  %v2536_v57 = vcombine.high %v832_v46, %v839_v47  ;;  %v860_v59 = vcombine.low %v766_v42, %v773_v43 }
 0x312   : > { %v2534_v63 = vcombine.high %v766_v42, %v773_v43  ;;  %v1217_v0 = vrot.slane %v2541_v53, %v2958_v15  ;;  %v1218_v1 = vcombine.low %v1193_v35, %v1201_v45  ;;  %v883_v2 = vrot.slane %v876_v44, %v2958_v15 }
 0x313   : > { %v926_v3 = vcombine.low %v848_v54, %v855_v55  ;;  %v2537_v4 = vcombine.high %v848_v54, %v855_v55  ;;  %v1183_v6 = vrot.slane %v1176_v41, %v2962_v22  ;;  %v891_v7 = vrot.slane %v2535_v50, %v2958_v15 }
 0x314   : > { %v917_v8 = vrot.slane %v910_v56, %v2958_v15  ;;  %v925_v9 = vrot.slane %v2536_v57, %v2958_v15  ;;  %v1226_v11 = vcombine.low %v1209_v52, %v1217_v0  ;;  %v1175_v12 = vrot.slane %v1168_v51, %v2962_v22 }
 0x315   : > { %v933_v13 = vrot.slane %v926_v3, %v2958_v15  ;;  %v941_v14 = vrot.slane %v2537_v4, %v2958_v15  ;;  %v867_v16 = vrot.slane %v860_v59, %v2958_v15  ;;  %v875_v17 = vrot.slane %v2534_v63, %v2958_v15 }
 0x316   : > { %v1225_v18 = vrot.slane %v1218_v1, %v2962_v22  ;;  %v1233_v19 = vrot.slane %v1226_v11, %v2962_v22  ;;  %v1184_v21 = vcombine.low %v1175_v12, %v1183_v6  ;;  %v900_v24 = vcombine.low %v883_v2, %v891_v7 }
 0x317   : > { %v950_v20 = vcombine.low %v933_v13, %v941_v14  ;;  %v942_v25 = vcombine.low %v917_v8, %v925_v9  ;;  %v892_v27 = vcombine.low %v867_v16, %v875_v17  ;;  %v1185_v44 = vcombine.high %v1175_v12, %v1183_v6 }
 0x318   : > { %v1234_v23 = vcombine.low %v1225_v18, %v1233_v19  ;;  %v907_v31 = vrot.slane %v900_v24, %v2962_v22  ;;  %v1239_v33 = vshrl.u32 %v1184_v21, 16  ;;  %v1235_v42 = vcombine.high %v1225_v18, %v1233_v19 }
 0x319   : > { %v957_v28 = vrot.slane %v950_v20, %v2962_v22  ;;  %v949_v32 = vrot.slane %v942_v25, %v2962_v22  ;;  %v899_v35 = vrot.slane %v892_v27, %v2962_v22  ;;  %v1245_v51 = vshrl.u32 %v1185_v44, 16 }
 0x31a   : > { %v1238_v26 = vpack.i.b16 %v1234_v23, %v1184_v21  ;;  %v1240_v29 = vshrl.u32 %v1234_v23, 16  ;;  %v1244_v46 = vpack.i.b16 %v1235_v42, %v1185_v44  ;;  %v1246_v49 = vshrl.u32 %v1235_v42, 16 }
 0x31b   : > { %v958_v36 = vcombine.low %v949_v32, %v957_v28  ;;  %v908_v38 = vcombine.low %v899_v35, %v907_v31  ;;  %v959_v50 = vcombine.high %v949_v32, %v957_v28  ;;  %v909_v52 = vcombine.high %v899_v35, %v907_v31 }
 0x31c   : > { %v1525_v30 = vsel %vm1520_vm2, %v1238_v26, 0  ;;  %v1241_v39 = vpack.i.b16 %v1240_v29, %v1239_v33  ;;  %v1619_v48 = vsel %vm1520_vm2, %v1244_v46, 0  ;;  %v1247_v53 = vpack.i.b16 %v1246_v49, %v1245_v51 }
 0x31d   : > { %2624 = vmatpush3.bf16.xpose.msra.mxu1 %v1525_v30  ;;  %v962_v40 = vpack.i.b16 %v958_v36, %v908_v38  ;;  %v964_v43 = vshrl.u32 %v958_v36, 16  ;;  %v963_v45 = vshrl.u32 %v908_v38, 16  ;;  %v968_v54 = vpack.i.b16 %v959_v50, %v909_v52 }
 0x31e   : > { %2629 = vmatprep.subr.bf16.mxu1 %v2776_v5  ;;  %v1572_v41 = vsel %vm1520_vm2, %v1241_v39, 0  ;;  %v1666_v55 = vsel %vm1520_vm2, %v1247_v53, 0  ;;  %v970_v56 = vshrl.u32 %v959_v50, 16  ;;  %v969_v57 = vshrl.u32 %v909_v52, 16 }
 0x31f   : > { %v965_v47 = vpack.i.b16 %v964_v43, %v963_v45 }
 0x320   : > { %v971_v59 = vpack.i.b16 %v970_v56, %v969_v57 }
 0x324   : > { %2626 = vmatmul.mubr.msk.bf16.vlgmr.msra.gmra.mxu1 %vm1520_vm2, %v962_v40 }
 0x325   : > { %2630 = vmatpush3.bf16.xpose.msra.mxu1 %v1572_v41  ;;  %2631 = vmatprep.mubr.msk.bf16.mxu1 %vm2777_vm1, %v2776_v5 }
 0x326   : > { %2635 = vmatprep.subr.bf16.mxu1 %v2776_v5 }
 0x32c   : > { %2632 = vmatmul.mubr.msk.bf16.vlgmr.msra.gmra.mxu1 %vm1520_vm2, %v965_v47 }
 0x32d   : > { %2636 = vmatpush3.bf16.xpose.msra.mxu1 %v1619_v48  ;;  %2637 = vmatprep.mubr.msk.bf16.mxu1 %vm2777_vm1, %v2776_v5 }
 0x32e   : > { %2641 = vmatprep.subr.bf16.mxu1 %v2776_v5 }
 0x334   : > { %2638 = vmatmul.mubr.msk.bf16.vlgmr.msra.gmra.mxu1 %vm1520_vm2, %v968_v54 }
 0x335   : > { %2642 = vmatpush3.bf16.xpose.msra.mxu1 %v1666_v55  ;;  %2643 = vmatprep.mubr.msk.bf16.mxu1 %vm2777_vm1, %v2776_v5 }
 0x336   : > { %2647 = vmatprep.subr.bf16.mxu1 %v2776_v5 }
 0x33c   : > { %2644 = vmatmul.mubr.msk.bf16.vlgmr.msra.gmra.mxu1 %vm1520_vm2, %v971_v59 }
 0x33d   : > { %2649 = vmatprep.mubr.msk.bf16.mxu1 %vm2777_vm1, %v2776_v5 }
 0x3e4   : > { %v1561_v63 = vpop.f32.mrf.mxu1 }
 0x3e5   : > { %v1710_v0 = vsel %vm1709_vm3, %v1561_v63, -inf }
 0x3e6   : > { %1711 = vmax.xlane.f32.xlu0 %v1710_v0  ;;  %v2627_v1 = vpop.f32.mrf.mxu1 }
 0x3e8   : > { %v1564_v2 = vpop.f32.mrf.mxu1 }
 0x3e9   : > { %v1713_v3 = vsel %vm1709_vm3, %v1564_v2, -inf }
 0x3ea   : > { %1714 = vmax.xlane.f32.xlu1 %v1713_v3  ;;  %v2628_v4 = vpop.f32.mrf.mxu1 }
 0x3ec   : > { %v1608_v6 = vpop.f32.mrf.mxu1 }
 0x3ed   : > { %v1716_v7 = vsel %vm1709_vm3, %v1608_v6, -inf }
 0x3ee   : > { %1717 = vmax.xlane.f32.xlu0 %v1716_v7  ;;  %v2633_v8 = vpop.f32.mrf.mxu1 }
 0x3f0   : > { %v3052_v9 = vpop.f32.mrf.mxu1 }
 0x3f1   : > { %v1719_v11 = vsel %vm1709_vm3, %v3052_v9, -inf }
 0x3f2   : > { %1720 = vmax.xlane.f32.xlu0 %v1719_v11  ;;  %v2634_v12 = vpop.f32.mrf.mxu1 }
 0x3f4   : > { %v1655_v13 = vpop.f32.mrf.mxu1 }
 0x3f5   : > { %v1722_v14 = vsel %vm1709_vm3, %v1655_v13, -inf }
 0x3f6   : > { %1723 = vmax.xlane.f32.xlu0 %v1722_v14  ;;  %v2639_v16 = vpop.f32.mrf.mxu1 }
 0x3f8   : > { %v1658_v17 = vpop.f32.mrf.mxu1 }
 0x3f9   : > { %v1725_v18 = vsel %vm1709_vm3, %v1658_v17, -inf }
 0x3fa   : > { %1726 = vmax.xlane.f32.xlu1 %v1725_v18  ;;  %v2640_v19 = vpop.f32.mrf.mxu1 }
 0x3fc   : > { %v1702_v20 = vpop.f32.mrf.mxu1 }
 0x3fd   : > { %v1728_v21 = vsel %vm1709_vm3, %v1702_v20, -inf }
 0x3fe   : > { %1729 = vmax.xlane.f32.xlu0 %v1728_v21  ;;  %v2645_v23 = vpop.f32.mrf.mxu1 }
 0x400   : > { %v1705_v24 = vpop.f32.mrf.mxu1 }
 0x401   : > { %v1731_v26 = vsel %vm1709_vm3, %v1705_v24, -inf }
 0x402   : > { %v2646_v25 = vpop.f32.mrf.mxu1 }
 0x40b   : > { %1250 = vrot.lane.b32.xlu1 %v2945_v61, %s2785_s28 }
 0x414   : > { %1248 = vrot.lane.b32.xlu0 %v2935_v58, %s2785_s28 }
 0x42f   : > { %1732 = vmax.xlane.f32.xlu1 %v1731_v26 }
 0x440   : > { %1252 = vrot.lane.b32.xlu1 %v2943_v60, %s2785_s28 }
 0x46f   : > { %v1712_v27 = vpop.xlane.xlu0 %1711 }
 0x470   : > { %v1734_v28 = vsub.f32 %v1561_v63, %v1712_v27 }
 0x472   : > { %v1742_v29 = vmul.f32 1.442695, %v1734_v28 }
 0x473   : > { %v1715_v30 = vpop.xlane.xlu1 %1714 }
 0x474   : > { %2730 = vpow2.f32 %v1742_v29  ;;  %v1735_v31 = vsub.f32 %v1564_v2, %v1715_v30 }
 0x476   : > { %v1744_v32 = vmul.f32 1.442695, %v1735_v31 }
 0x477   : > { %v1718_v33 = vpop.xlane.xlu0 %1717 }
 0x478   : > { %2732 = vpow2.f32 %v1744_v32  ;;  %v1736_v35 = vsub.f32 %v1608_v6, %v1718_v33 }
 0x47a   : > { %v1746_v61 = vmul.f32 1.442695, %v1736_v35 }
 0x47b   : > { %v1721_v36 = vpop.xlane.xlu0 %1720 }
 0x47c   : > { %2734 = vpow2.f32 %v1746_v61  ;;  %v1737_v57 = vsub.f32 %v3052_v9, %v1721_v36 }
 0x47e   : > { %v1748_v59 = vmul.f32 1.442695, %v1737_v57 }
 0x47f   : > { %v1724_v58 = vpop.xlane.xlu0 %1723 }
 0x480   : > { %v1738_v38 = vsub.f32 %v1655_v13, %v1724_v58 }
 0x481   : > { %v3066_v39 = vpop.eup %2730 }
 0x482   : > { %v1750_v40 = vmul.f32 1.442695, %v1738_v38  ;;  %v1758_v60 = vsel %vm1709_vm3, %v3066_v39, 0.0 }
 0x483   : > { %v1727_v41 = vpop.xlane.xlu1 %1726  ;;  %1759 = vadd.xlane.f32.xlu0 %v1758_v60 }
 0x484   : > { %2736 = vpow2.f32 %v1750_v40  ;;  %v1739_v42 = vsub.f32 %v1658_v17, %v1727_v41 }
 0x485   : > { %v3070_v43 = vpop.eup %2732 }
 0x486   : > { %v1752_v44 = vmul.f32 1.442695, %v1739_v42  ;;  %v1761_v45 = vsel %vm1709_vm3, %v3070_v43, 0.0 }
 0x487   : > { %v1730_v46 = vpop.xlane.xlu0 %1729  ;;  %1762 = vadd.xlane.f32.xlu1 %v1761_v45  ;;  %v1251_v63 = vpop.permute.xlu1 %1250 }
 0x488   : > { %2738 = vpow2.f32 %v1752_v44  ;;  %v1740_v47 = vsub.f32 %v1702_v20, %v1730_v46  ;;  %v1261_v11 = vshrl.u32 %v1251_v63, 16 }
 0x489   : > { %v3074_v48 = vpop.eup %2734 }
 0x48a   : > { %v1754_v49 = vmul.f32 1.442695, %v1740_v47  ;;  %v1764_v50 = vsel %vm1709_vm3, %v3074_v48, 0.0 }
 0x48b   : > { %1765 = vadd.xlane.f32.xlu0 %v1764_v50  ;;  %v1249_v7 = vpop.permute.xlu0 %1248 }
 0x48c   : > { %2740 = vpow2.f32 %v1754_v49  ;;  %v1260_v9 = vshrl.u32 %v1249_v7, 16  ;;  %v1258_v12 = vpack.i.b16 %v1251_v63, %v1249_v7 }
 0x48d   : > { %2742 = vpow2.f32 %v1748_v59 }
 0x48e   : > { %v1262_v14 = vpack.i.b16 %v1261_v11, %v1260_v9  ;;  %v1272_v16 = vcombine.high %v1258_v12, %v2955_v10 }
 0x490   : > { %v1338_v23 = vcombine.high %v1262_v14, %v2955_v10  ;;  %v1286_v28 = vrot.slane %v1272_v16, %v2958_v15  ;;  %v1345_v35 = vrot.slane %v1262_v14, %v2958_v15 }
 0x491   : > { %v3078_v51 = vpop.eup %2736 }
 0x492   : > { %v1770_v52 = vsel %vm1709_vm3, %v3078_v51, 0.0  ;;  %v1352_v61 = vrot.slane %v1338_v23, %v2958_v15 }
 0x493   : > { %1771 = vadd.xlane.f32.xlu0 %v1770_v52 }
 0x495   : > { %v3082_v53 = vpop.eup %2738 }
 0x496   : > { %v1773_v54 = vsel %vm1709_vm3, %v3082_v53, 0.0 }
 0x497   : > { %1774 = vadd.xlane.f32.xlu0 %v1773_v54 }
 0x498   : > { %1254 = vrot.lane.b32.xlu1 %v2949_v62, %s2785_s28 }
 0x499   : > { %v3088_v55 = vpop.eup %2740 }
 0x49a   : > { %v1776_v56 = vsel %vm1709_vm3, %v3088_v55, 0.0  ;;  %v3093_v0 = vpop.eup %2742 }
 0x49b   : > { %1777 = vadd.xlane.f32.xlu0 %v1776_v56  ;;  %v1767_v4 = vsel %vm1709_vm3, %v3093_v0, 0.0 }
 0x4b8   : > { %v1733_v1 = vpop.xlane.xlu1 %1732 }
 0x4b9   : > { %v1741_v2 = vsub.f32 %v1705_v24, %v1733_v1  ;;  %v1279_v24 = vrot.slane %v1258_v12, %v2958_v15 }
 0x4bb   : > { %v1756_v3 = vmul.f32 1.442695, %v1741_v2 }
 0x4bc   : > { %1768 = vadd.xlane.f32.xlu1 %v1767_v4  ;;  %v1253_v8 = vpop.permute.xlu1 %1252 }
 0x4bd   : > { %2744 = vpow2.f32 %v1756_v3  ;;  %v1268_v19 = vshrl.u32 %v1253_v8, 16 }
 0x4ca   : > { %v3097_v62 = vpop.eup %2744 }
 0x4cb   : > { %v1779_v6 = vsel %vm1709_vm3, %v3097_v62, 0.0 }
 0x4cc   : > { %1780 = vadd.xlane.f32.xlu1 %v1779_v6 }
 0x50c   : > { %v1760_v17 = vpop.xlane.xlu0 %1759 }
 0x510   : > { %v1763_v13 = vpop.xlane.xlu1 %1762 }
 0x511   : > { %2746 = vrcp.f32 %v1763_v13 }
 0x512   : > { %2748 = vrcp.f32 %v1760_v17 }
 0x514   : > { %v1255_v18 = vpop.permute.xlu1 %1254  ;;  %v3107_v29 = vpop.xlane.xlu0 %1765 }
 0x515   : > { %v1266_v20 = vpack.i.b16 %v1255_v18, %v1253_v8  ;;  %v1269_v21 = vshrl.u32 %v1255_v18, 16 }
 0x517   : > { %v1270_v25 = vpack.i.b16 %v1269_v21, %v1268_v19  ;;  %v1287_v26 = vcombine.high %v1266_v20, %v2955_v10  ;;  %v1294_v27 = vrot.slane %v1266_v20, %v2958_v15 }
 0x519   : > { %v1301_v30 = vrot.slane %v1287_v26, %v2958_v15  ;;  %v1302_v31 = vcombine.low %v1279_v24, %v1294_v27  ;;  %v1303_v32 = vcombine.high %v1279_v24, %v1294_v27  ;;  %v1353_v33 = vcombine.high %v1270_v25, %v2955_v10 }
 0x51a   : > { %v1360_v36 = vrot.slane %v1270_v25, %v2958_v15 }
 0x51b   : > { %v1310_v58 = vrot.slane %v1302_v31, %v2962_v22  ;;  %v1317_v38 = vrot.slane %v1303_v32, %v2962_v22  ;;  %v1318_v40 = vcombine.low %v1286_v28, %v1301_v30  ;;  %v1319_v60 = vcombine.high %v1286_v28, %v1301_v30 }
 0x51c   : > { %v1367_v41 = vrot.slane %v1353_v33, %v2958_v15  ;;  %v1368_v42 = vcombine.low %v1345_v35, %v1360_v36  ;;  %v1369_v44 = vcombine.high %v1345_v35, %v1360_v36  ;;  %v1772_v45 = vpop.xlane.xlu0 %1771 }
 0x51d   : > { %v1326_v10 = vrot.slane %v1318_v40, %v2962_v22  ;;  %v1333_v46 = vrot.slane %v1319_v60, %v2962_v22  ;;  %v1404_v47 = vcombine.low %v1310_v58, %v1317_v38  ;;  %v2542_v49 = vcombine.high %v1310_v58, %v1317_v38 }
 0x51e   : > { %v1376_v50 = vrot.slane %v1368_v42, %v2962_v22  ;;  %v1383_v52 = vrot.slane %v1369_v44, %v2962_v22  ;;  %v1384_v54 = vcombine.low %v1352_v61, %v1367_v41  ;;  %v1385_v56 = vcombine.high %v1352_v61, %v1367_v41  ;;  %v2747_v24 = vpop.eup %2746 }
 0x51f   : > { %v1411_v57 = vrot.slane %v1404_v47, %v2958_v15  ;;  %v1419_v59 = vrot.slane %v2542_v49, %v2958_v15  ;;  %v1420_v63 = vcombine.low %v1326_v10, %v1333_v46  ;;  %v2543_v1 = vcombine.high %v1326_v10, %v1333_v46  ;;  %v2749_v28 = vpop.eup %2748 }
 0x520   : > { %v1392_v2 = vrot.slane %v1384_v54, %v2962_v22  ;;  %v1399_v3 = vrot.slane %v1385_v56, %v2962_v22  ;;  %v1454_v4 = vcombine.low %v1376_v50, %v1383_v52  ;;  %v2544_v6 = vcombine.high %v1376_v50, %v1383_v52  ;;  %v1775_v7 = vpop.xlane.xlu0 %1774 }
 0x521   : > { %v1427_v8 = vrot.slane %v1420_v63, %v2958_v15  ;;  %v1435_v9 = vrot.slane %v2543_v1, %v2958_v15  ;;  %2750 = vrcp.f32 %v1772_v45  ;;  %v1436_v17 = vcombine.low %v1411_v57, %v1419_v59  ;;  %v1982_v59 = vld [vmem:[%s3254_s9] sm:$0xf] }
 0x522   : > { %v1461_v11 = vrot.slane %v1454_v4, %v2958_v15  ;;  %v1469_v12 = vrot.slane %v2544_v6, %v2958_v15  ;;  %v1470_v13 = vcombine.low %v1392_v2, %v1399_v3  ;;  %v2545_v14 = vcombine.high %v1392_v2, %v1399_v3  ;;  %v1984_v3 = vld [vmem:[%s3254_s9 + $0x8] sm:$0xf] }
 0x523   : > { %2752 = vrcp.f32 %v1775_v7  ;;  %v1444_v16 = vcombine.low %v1427_v8, %v1435_v9  ;;  %v1443_v25 = vrot.slane %v1436_v17, %v2962_v22  ;;  %v1791_v35 = vmul.f32 %v2747_v24, %v3070_v43 }
 0x524   : > { %v1477_v18 = vrot.slane %v1470_v13, %v2958_v15  ;;  %v1485_v19 = vrot.slane %v2545_v14, %v2958_v15  ;;  %v1486_v20 = vcombine.low %v1461_v11, %v1469_v12  ;;  %v1790_v58 = vmul.f32 %v2749_v28, %v3066_v39 }
 0x525   : > { %v1451_v21 = vrot.slane %v1444_v16, %v2962_v22  ;;  %2754 = vrcp.f32 %v3107_v29  ;;  %v1991_v63 = vsel %vm1989_vm4, %v1982_v59, 0  ;;  %v2085_v8 = vsel %vm1989_vm4, %v1984_v3, 0 }
 0x526   : > { %v1494_v23 = vcombine.low %v1477_v18, %v1485_v19  ;;  %v1493_v26 = vrot.slane %v1486_v20, %v2962_v22  ;;  %v1798_v60 = vpack.c.bf16 %v1791_v35, %v1790_v58  ;;  %v1985_v18 = vld [vmem:[%s3254_s9 + $0xc] sm:$0xf] }
 0x527   : > { %v1452_v30 = vcombine.low %v1443_v25, %v1451_v21  ;;  %v1453_v32 = vcombine.high %v1443_v25, %v1451_v21  ;;  %v2132_v21 = vsel %vm1989_vm4, %v1985_v18, 0 }
 0x528   : > { %v1501_v27 = vrot.slane %v1494_v23, %v2962_v22 }
 0x529   : > { %v1508_v40 = vshrl.u32 %v1452_v30, 16  ;;  %v1516_v50 = vshrl.u32 %v1453_v32, 16 }
 0x52a   : > { %v1502_v31 = vcombine.low %v1493_v26, %v1501_v27  ;;  %v1503_v33 = vcombine.high %v1493_v26, %v1501_v27 }
 0x52c   : > { %v1506_v61 = vpack.i.b16 %v1502_v31, %v1452_v30  ;;  %v1514_v15 = vpack.i.b16 %v1503_v33, %v1453_v32  ;;  %v1509_v36 = vshrl.u32 %v1502_v31, 16 }
 0x52e   : > { %v2751_v38 = vpop.eup %2750  ;;  %2648 = vmatpush3.bf16.msra.mxu1 %v1506_v61  ;;  %2660 = vmatpush3.bf16.msra.mxu0 %v1514_v15  ;;  %v1510_v41 = vpack.i.b16 %v1509_v36, %v1508_v40 }
 0x52f   : > { %2653 = vmatprep.subr.bf16.mxu1 %v2776_v5  ;;  %2671 = vmatprep.subr.bf16.mxu0 %v2776_v5  ;;  %v1794_v43 = vmul.f32 %v2751_v38, %v3078_v51  ;;  %v1778_v51 = vpop.xlane.xlu0 %1777 }
 0x530   : > { %v2753_v22 = vpop.eup %2752 }
 0x531   : > { %2650 = vmatmul.mubr.msk.bf16.vlgmr.msra.gmra.mxu1 %vm1709_vm3, %v1798_v60  ;;  %v1795_v42 = vmul.f32 %v2753_v22, %v3082_v53  ;;  %v1517_v53 = vshrl.u32 %v1503_v33, 16 }
 0x532   : > { %2654 = vmatpush3.bf16.msra.mxu1 %v1510_v41  ;;  %2655 = vmatprep.mubr.msk.bf16.mxu1 %vm2777_vm1, %v2776_v5  ;;  %v2755_v45 = vpop.eup %2754 }
 0x533   : > { %v1800_v39 = vpack.c.bf16 %v1795_v42, %v1794_v43  ;;  %2665 = vmatprep.subr.bf16.mxu1 %v2776_v5  ;;  %v1792_v46 = vmul.f32 %v2755_v45, %v3074_v48  ;;  %v1518_v54 = vpack.i.b16 %v1517_v53, %v1516_v50 }
 0x535   : > { %2662 = vmatmul.mubr.msk.bf16.vlgmr.msra.gmra.mxu0 %vm1709_vm3, %v1800_v39 }
 0x536   : > { %2673 = vmatprep.mubr.msk.bf16.mxu0 %vm2777_vm1, %v2776_v5  ;;  %2672 = vmatpush3.bf16.msra.mxu0 %v1991_v63  ;;  %v2766_v63 = vld [vmem:[%s2872_s30] sm:$0xff] }
 0x537   : > { %2683 = vmatprep.subr.bf16.mxu0 %v2776_v5 }
 0x545   : > { %v1769_v44 = vpop.xlane.xlu1 %1768 }
 0x546   : > { %2756 = vrcp.f32 %v1769_v44 }
 0x547   : > { %2758 = vrcp.f32 %v1778_v51 }
 0x553   : > { %v2757_v10 = vpop.eup %2756 }
 0x554   : > { %v1793_v47 = vmul.f32 %v2757_v10, %v3093_v0  ;;  %v2759_v29 = vpop.eup %2758 }
 0x555   : > { %v1781_v49 = vpop.xlane.xlu1 %1780  ;;  %v1796_v57 = vmul.f32 %v2759_v29, %v3088_v55  ;;  %v1983_v55 = vld [vmem:[%s3254_s9 + $0x4] sm:$0xf] }
 0x556   : > { %2760 = vrcp.f32 %v1781_v49  ;;  %v1799_v52 = vpack.c.bf16 %v1793_v47, %v1792_v46  ;;  %v2558_v46 = vld [vmem:[%s3255_s10] ss:$0 sm:$0xff] }
 0x558   : > { %2656 = vmatmul.mubr.msk.bf16.vlgmr.msra.gmra.mxu1 %vm1709_vm3, %v1799_v52  ;;  %v2559_v52 = vld [vmem:[%s513_s23] ss:$0 sm:$0xff]  ;;  %s516_s23 = scalar_lea.vmem %s3249_s4, %s3260_s26 }
 0x559   : > { %2666 = vmatpush3.bf16.msra.mxu1 %v1518_v54  ;;  %2667 = vmatprep.mubr.msk.bf16.mxu1 %vm2777_vm1, %v2776_v5 }
 0x55a   : > { %2677 = vmatprep.subr.bf16.mxu1 %v2776_v5 }
 0x563   : > { %v2761_v56 = vpop.eup %2760 }
 0x564   : > { %v1797_v48 = vmul.f32 %v2761_v56, %v3097_v62  ;;  %v2038_v62 = vsel %vm1989_vm4, %v1983_v55, 0 }
 0x566   : > { %v1801_v0 = vpack.c.bf16 %v1797_v48, %v1796_v57 }
 0x568   : > { %2668 = vmatmul.mubr.msk.bf16.vlgmr.msra.gmra.mxu1 %vm1709_vm3, %v1801_v0 }
 0x569   : > { %2679 = vmatprep.mubr.msk.bf16.mxu1 %vm2777_vm1, %v2776_v5  ;;  %2678 = vmatpush3.bf16.msra.mxu1 %v2038_v62 }
 0x56a   : > { %2689 = vmatprep.subr.bf16.mxu1 %v2776_v5 }
 0x5f1   : > { %v1839_v1 = vpop.f32.mrf.mxu1 }
 0x5f3   : > { %v2651_v2 = vpop.f32.mrf.mxu1 }
 0x5f5   : > { %v1927_v4 = vpop.f32.mrf.mxu0  ;;  %v1842_v6 = vpop.f32.mrf.mxu1 }
 0x5f6   : > { %v1978_v7 = vpack.c.bf16 %v1842_v6, %v1839_v1 }
 0x5f7   : > { %v2663_v9 = vpop.f32.mrf.mxu0  ;;  %v2652_v11 = vpop.f32.mrf.mxu1 }
 0x5f8   : > { %2674 = vmatmul.mubr.msk.bf16.vlgmr.msra.gmra.mxu0 %vm1520_vm2, %v1978_v7 }
 0x5f9   : > { %v1930_v12 = vpop.f32.mrf.mxu0  ;;  %2684 = vmatpush3.bf16.msra.mxu0 %v2085_v8  ;;  %2685 = vmatprep.mubr.msk.bf16.mxu0 %vm2777_vm1, %v2776_v5 }
 0x5fa   : > { %2695 = vmatprep.subr.mxu0 %v2776_v5  ;;  %v1980_v14 = vpack.c.bf16 %v1930_v12, %v1927_v4  ;;  %v2767_v4 = vld [vmem:[%s2872_s30 + $0x8] sm:$0xff] }
 0x5fb   : > { %v2664_v13 = vpop.f32.mrf.mxu0 }
 0x600   : > { %2686 = vmatmul.mubr.msk.bf16.vlgmr.msra.gmra.mxu0 %vm1520_vm2, %v1980_v14 }
 0x601   : > { %2699 = vmatprep.mubr.msk.f32.mxu0 %vm2777_vm1, %v2776_v5 }
 0x618   : > { %v1883_v16 = vpop.f32.mrf.mxu1 }
 0x61a   : > { %v2657_v17 = vpop.f32.mrf.mxu1 }
 0x61c   : > { %v1886_v19 = vpop.f32.mrf.mxu1 }
 0x61d   : > { %v1979_v20 = vpack.c.bf16 %v1886_v19, %v1883_v16 }
 0x61e   : > { %v2658_v23 = vpop.f32.mrf.mxu1 }
 0x61f   : > { %2680 = vmatmul.mubr.msk.bf16.vlgmr.msra.gmra.mxu1 %vm1520_vm2, %v1979_v20 }
 0x620   : > { %2690 = vmatpush3.bf16.msra.mxu1 %v2132_v21  ;;  %2691 = vmatprep.mubr.msk.bf16.mxu1 %vm2777_vm1, %v2776_v5 }
 0x628   : > { %v1971_v24 = vpop.f32.mrf.mxu1 }
 0x62a   : > { %v2669_v25 = vpop.f32.mrf.mxu1 }
 0x62c   : > { %v1974_v26 = vpop.f32.mrf.mxu1 }
 0x62d   : > { %v1981_v27 = vpack.c.bf16 %v1974_v26, %v1971_v24 }
 0x62e   : > { %v2670_v28 = vpop.f32.mrf.mxu1 }
 0x62f   : > { %2692 = vmatmul.mubr.msk.bf16.vlgmr.msra.gmra.mxu1 %vm1520_vm2, %v1981_v27  ;;  %v2248_v28 = vld [vmem:[%s519_s20] sm:$0x1] }
 0x6b8   : > { %v2027_v30 = vpop.f32.mrf.mxu0 }
 0x6b9   : > { %v2175_v41 = vsel %vm537_vm0, %v2027_v30, 0.0  ;;  %v2249_v30 = vadd.f32 1.0, %v2248_v28 }
 0x6ba   : > { %v2675_v31 = vpop.f32.mrf.mxu0 }
 0x6bc   : > { %v2030_v32 = vpop.f32.mrf.mxu0 }
 0x6bd   : > { %v2182_v39 = vsel %vm537_vm0, %v2030_v32, 0.0 }
 0x6be   : > { %v2676_v33 = vpop.f32.mrf.mxu0 }
 0x6c0   : > { %v2121_v35 = vpop.f32.mrf.mxu0 }
 0x6c1   : > { %v2178_v44 = vsel %vm537_vm0, %v2121_v35, 0.0 }
 0x6c2   : > { %v2687_v61 = vpop.f32.mrf.mxu0 }
 0x6c3   : > { %v2254_v61 = vrot.slane %v2249_v30, %v570_v37 }
 0x6c4   : > { %v2124_v15 = vpop.f32.mrf.mxu0 }
 0x6c5   : > { %v2185_v50 = vsel %vm537_vm0, %v2124_v15, 0.0 }
 0x6c6   : > { %v2688_v36 = vpop.f32.mrf.mxu0 }
 0x6c7   : > { %v2562_v36 = vld [vmem:[%s516_s23] ss:$0 sm:$0xff] }
 0x6df   : > { %v2074_v58 = vpop.f32.mrf.mxu1 }
 0x6e0   : > { %v2176_v22 = vsel %vm537_vm0, %v2074_v58, 0.0 }
 0x6e1   : > { %v2681_v38 = vpop.f32.mrf.mxu1  ;;  %v2177_v43 = vadd.f32 %v2176_v22, %v2175_v41 }
 0x6e3   : > { %v2077_v40 = vpop.f32.mrf.mxu1  ;;  %v2179_v10 = vadd.f32 %v2178_v44, %v2177_v43 }
 0x6e4   : > { %v2183_v42 = vsel %vm537_vm0, %v2077_v40, 0.0 }
 0x6e5   : > { %v2682_v60 = vpop.f32.mrf.mxu1  ;;  %v2184_v45 = vadd.f32 %v2183_v42, %v2182_v39 }
 0x6e6   : > { %v2267_v60 = vld [vmem:[%s3251_s6] sm:$0xf] }
 0x6e7   : > { %v2186_v56 = vadd.f32 %v2185_v50, %v2184_v45 }
 0x6ef   : > { %v2168_v51 = vpop.f32.mrf.mxu1 }
 0x6f0   : > { %v2180_v53 = vsel %vm537_vm0, %v2168_v51, 0.0 }
 0x6f1   : > { %v2181_v47 = vadd.f32 %v2180_v53, %v2179_v10  ;;  %v2693_v49 = vpop.f32.mrf.mxu1 }
 0x6f3   : > { %v2196_v54 = vadd.f32 %v2558_v46, %v2181_v47  ;;  %v2171_v29 = vpop.f32.mrf.mxu1 }
 0x6f4   : > { %v2187_v57 = vsel %vm537_vm0, %v2171_v29, 0.0 }
 0x6f5   : > { %v2205_v48 = vmul.f32 %v2559_v52, %v2196_v54  ;;  %v2188_v0 = vadd.f32 %v2187_v57, %v2186_v56  ;;  %v2694_v59 = vpop.f32.mrf.mxu1 }
 0x6f7   : > { %v2207_v55 = vadd.f32 %v2766_v63, %v2205_v48  ;;  %v2197_v62 = vadd.f32 %v2558_v46, %v2188_v0 }
 0x6f9   : > { %2209 = vst.msk [vmem:[%s524_s16] sm:$0xff] %vm537_vm0, %v2207_v55  ;;  %v2571_v1 = vpack.c.bf16 %v2207_v55, %v2207_v55  ;;  %v2206_v2 = vmul.f32 %v2559_v52, %v2197_v62  ;;  %v2222_v3 = vsel %vm537_vm0, %v2207_v55, 0.0 }
 0x6fa   : > { %2223 = vadd.xlane.f32.xlu1 %v2222_v3 }
 0x6fb   : > { %2220 = vst.msk [vmem:[%s529_s19] sm:$0xf] %vm2219_vm5, %v2571_v1  ;;  %v2208_v6 = vadd.f32 %v2767_v4, %v2206_v2 }
 0x6fd   : > { %2210 = vst.msk [vmem:[%s524_s16 + $0x8] sm:$0xff] %vm537_vm0, %v2208_v6  ;;  %v2572_v7 = vpack.c.bf16 %v2208_v6, %v2208_v6  ;;  %v2225_v8 = vsel %vm537_vm0, %v2208_v6, 0.0  ;;  %s533_s16 = scalar_lea.vmem %s3258_s13, %s2524_s29 }
 0x6fe   : > { %2226 = vadd.xlane.f32.xlu0 %v2225_v8 }
 0x6ff   : > { %2221 = vst.msk [vmem:[%s529_s19 + $0x4] sm:$0xf] %vm2219_vm5, %v2572_v7 }
 0x783   : > { %v2224_v9 = vpop.xlane.xlu1 %2223 }
 0x784   : > { %v2228_v11 = vmul.f32 0.03125, %v2224_v9 }
 0x786   : > { %v2230_v12 = vsub.f32 %v2207_v55, %v2228_v11 }
 0x787   : > { %v2227_v13 = vpop.xlane.xlu0 %2226 }
 0x788   : > { %v2229_v14 = vmul.f32 0.03125, %v2227_v13  ;;  %v2232_v16 = vmul.f32 %v2230_v12, %v2230_v12 }
 0x78a   : > { %v2231_v17 = vsub.f32 %v2208_v6, %v2229_v14  ;;  %v2234_v18 = vsel %vm537_vm0, %v2232_v16, 0.0 }
 0x78b   : > { %2235 = vadd.xlane.f32.xlu1 %v2234_v18 }
 0x78c   : > { %v2233_v19 = vmul.f32 %v2231_v17, %v2231_v17 }
 0x78e   : > { %v2237_v20 = vsel %vm537_vm0, %v2233_v19, 0.0 }
 0x78f   : > { %2238 = vadd.xlane.f32.xlu0 %v2237_v20 }
 0x814   : > { %v2236_v21 = vpop.xlane.xlu1 %2235 }
 0x815   : > { %v2240_v23 = vmul.f32 0.03125, %v2236_v21 }
 0x817   : > { %v2242_v24 = vadd.f32 1e-06, %v2240_v23 }
 0x818   : > { %v2239_v25 = vpop.xlane.xlu0 %2238 }
 0x819   : > { %v2241_v26 = vmul.f32 0.03125, %v2239_v25  ;;  %2762 = vrsqrt.f32 %v2242_v24 }
 0x81b   : > { %v2243_v27 = vadd.f32 1e-06, %v2241_v26 }
 0x81d   : > { %2764 = vrsqrt.f32 %v2243_v27 }
 0x826   : > { %v2763_v31 = vpop.eup %2762 }
 0x827   : > { %v2246_v33 = vmul.f32 %v2763_v31, %v2230_v12 }
 0x829   : > { %v2256_v38 = vmul.f32 %v2254_v61, %v2246_v33 }
 0x82a   : > { %v2765_v32 = vpop.eup %2764 }
 0x82b   : > { %v2247_v35 = vmul.f32 %v2765_v32, %v2231_v17  ;;  %v2265_v40 = vadd.f32 %v2562_v36, %v2256_v38 }
 0x82d   : > { %v2257_v15 = vmul.f32 %v2254_v61, %v2247_v35 }
 0x82f   : > { %v2266_v58 = vadd.f32 %v2562_v36, %v2257_v15 }
 0x831   : > { %2696 = vmatpush3.xpose.msk.msra.mxu0 %vm537_vm0, %v2266_v58 }
 0x832   : > { %2697 = vmatprep.subr.mxu0 %v2776_v5 }
 0x835   : > { %2698 = vmatpush3.xpose.msk.msra.mxu0 %vm537_vm0, %v2265_v40 }
 0x838   : > { %2700 = vmatmul.mubr.msk.f32.vlgmr.msra.gmra.mxu0 %vm537_vm0, %v2267_v60 }
 0x8f8   : > { %v2343_v34 = vpop.f32.mrf.mxu0 }
 0x8f9   : > { %2348 = vst.msk [vmem:[%s533_s16] sm:$0xf] %vm2347_vm6, %v2343_v34 }
 0x8fa   : > { %v2701_v37 = vpop.f32.mrf.mxu0 }
 0x8fb PF: > { %s24_s25 = sadd.s32 1, %s2774_s25  }
 0x8fc   : > { %p21_p4 = scmp.ge.s32.totalorder %s24_s25, 4  }
 0x8fe   :  { %23 = sbr.rel (!%p21_p4) target bundleno = 1 (0x1), region = 133 }

</bundles_post_ra>
